<compile_context>
chip_gen: v6e
topology: v6e:2x2x1
jax: 0.10.0
libtpu: 0.0.40
codegen_flags: <defaults>
</compile_context>

<pallas_src>
import functools
import math

import numpy as np
import jax
import jax.numpy as jnp
from jax import lax
from jax.experimental import pallas as pl
from jax.experimental.pallas import tpu as pltpu

KSIZE = 7
PAD = 3
CHUNK = 512          # epilogue lane-chunk size (bounds vreg live ranges)


def _round_up(x, m):
    return (x + m - 1) // m * m


def _pick_channel_tile(C, HW, itemsize, budget_bytes=4 << 20):
    """Channel tile Ct for the streaming reduction.

    Keeps each (Ct, HW) input block under `budget_bytes` so the double-buffered
    pipeline fits every generation's default scoped-VMEM limit.  Ct steps in
    multiples of the sublane packing factor (8 for 4-byte, 16 for 2-byte
    dtypes).  Returns (Ct, needs_tail_mask)."""
    sub = 8 * max(1, 4 // itemsize)
    if C * HW * itemsize <= budget_bytes or C <= sub:
        return C, False
    best = None
    for ct in range(sub, C + 1, sub):
        if C % ct == 0 and ct * HW * itemsize <= budget_bytes:
            best = ct
    if best is not None:
        return best, False
    # No exact divisor under budget: non-divisor tile + in-kernel tail mask.
    ct = (budget_bytes // (HW * itemsize)) // sub * sub
    ct = max(sub, min(ct, C))
    return ct, True


def _spatial_attention_kernel(w_ref, mask_ref, x_ref, o_ref,
                              sum_ref, max_ref, packed_ref,
                              *, W, C, needs_mask):
    # w_ref     : VMEM f32[14, 7]  rows 0..6  = avg taps (mean's 1/C folded in), by di
    #                              rows 7..13 = max taps, by di
    # mask_ref  : VMEM f32[7, HW]  per-dj column-validity masks (host constants)
    # x_ref     : VMEM x.dtype[1, Ct, HW]  one channel tile, spatial flattened (lane-dense)
    # o_ref     : VMEM f32[1, 1, HW]
    # sum_ref   : VMEM f32[1, HW]  running channel sum
    # max_ref   : VMEM f32[1, HW]  running channel max
    # packed_ref: VMEM f32[14, L]  sublane-packed row-shifted padded planes
    c = pl.program_id(1)
    nc = pl.num_programs(1)
    Ct = x_ref.shape[1]
    HW = x_ref.shape[2]

    @pl.when(c == 0)
    def _init():
        sum_ref[...] = jnp.zeros(sum_ref.shape, jnp.float32)
        max_ref[...] = jnp.full(max_ref.shape, -jnp.inf, jnp.float32)

    # ---- streaming channel reduction (HBM-DMA bound phase) ----
    blk = x_ref[0].astype(jnp.float32)          # cast in-kernel; HBM traffic stays native dtype
    if needs_mask:
        ch = lax.broadcasted_iota(jnp.int32, (Ct, HW), 0) + c * Ct
        valid = ch < C
        sum_blk = jnp.where(valid, blk, 0.0)
        max_blk = jnp.where(valid, blk, -jnp.inf)
    else:
        sum_blk = blk
        max_blk = blk
    sum_ref[...] += jnp.sum(sum_blk, axis=0, keepdims=True)
    max_ref[...] = jnp.maximum(max_ref[...], jnp.max(max_blk, axis=0, keepdims=True))

    # ---- 7x7 conv + sigmoid epilogue (last channel step only) ----
    @pl.when(c == nc - 1)
    def _finalize():
        # Pack the 7 row-shifted copies of the zero-padded flattened planes
        # into one sublane-dense scratch:
        #   packed[di,     k] = padded_sum[k + di*W]
        #   packed[7 + di, k] = padded_max[k + di*W]
        # so tap (di, dj) of output position f reads packed[{di,7+di}, f + dj].
        packed_ref[...] = jnp.zeros(packed_ref.shape, jnp.float32)
        for di in range(KSIZE):
            start = (PAD - di) * W + PAD        # padded index where plane[0,0] lands after the -di*W shift
            lo = max(0, start)
            src_lo = lo - start
            end = start + HW
            if end <= lo:
                continue                        # entire plane shifted out (degenerate tiny H)
            packed_ref[di:di + 1, lo:end] = sum_ref[:, src_lo:HW]
            packed_ref[KSIZE + di:KSIZE + di + 1, lo:end] = max_ref[:, src_lo:HW]

        # Chunked tap loop: per dj one (14, size) slice, one broadcast-FMA with
        # the (14, 1) weight column, one sublane reduction, one mask multiply.
        for c0 in range(0, HW, CHUNK):
            size = min(CHUNK, HW - c0)
            acc = jnp.zeros((1, size), jnp.float32)
            for dj in range(KSIZE):
                win = packed_ref[:, c0 + dj:c0 + dj + size]      # (14, size)
                wcol = w_ref[:, dj:dj + 1]                       # (14, 1)
                contrib = jnp.sum(win * wcol, axis=0, keepdims=True)
                acc = acc + contrib * mask_ref[dj:dj + 1, c0:c0 + size]
            o_ref[0, :, c0:c0 + size] = jax.nn.sigmoid(acc)


def spatial_attention(x, weight):
    """x: (B, C, H, W) float dtype (f32/bf16/f16); weight: (1, 2, 7, 7) -> (B, 1, H, W) f32."""
    B, C, H, W = x.shape
    HW = H * W
    L = _round_up(HW + 2 * PAD * W + 2 * PAD, 128)   # padded flattened plane length

    # Lane-dense layout (free, row-major reshape); keep native dtype for the HBM stream.
    x_flat = x.reshape(B, C, HW)

    # Tap table: rows 0..6 = avg taps with 1/C folded in, rows 7..13 = max taps.
    w = weight.astype(jnp.float32)
    wtab = jnp.concatenate([w[0, 0] / C, w[0, 1]], axis=0)          # (14, 7)

    # Host-precomputed per-dj column-validity masks (applied with one vmul per dj).
    col = np.arange(HW, dtype=np.int64) % W
    masks = np.stack(
        [(col >= PAD - dj) & (col < W + PAD - dj) for dj in range(KSIZE)]
    ).astype(np.float32)                                            # (7, HW)
    masks = jnp.asarray(masks)

    itemsize = np.dtype(x.dtype).itemsize
    Ct, needs_mask = _pick_channel_tile(C, HW, itemsize)
    NC = -(-C // Ct)

    out = pl.pallas_call(
        functools.partial(_spatial_attention_kernel, W=W, C=C, needs_mask=needs_mask),
        out_shape=jax.ShapeDtypeStruct((B, 1, HW), jnp.float32),
        grid_spec=pltpu.PrefetchScalarGridSpec(
            num_scalar_prefetch=0,
            grid=(B, NC),
            in_specs=[
                pl.BlockSpec((2 * KSIZE, KSIZE), lambda b, c: (0, 0)),   # tap table
                pl.BlockSpec((KSIZE, HW), lambda b, c: (0, 0)),          # column masks
                pl.BlockSpec((1, Ct, HW), lambda b, c: (b, c, 0)),       # x channel tile
            ],
            out_specs=pl.BlockSpec((1, 1, HW), lambda b, c: (b, 0, 0)),
            scratch_shapes=[
                pltpu.VMEM((1, HW), jnp.float32),          # running channel sum
                pltpu.VMEM((1, HW), jnp.float32),          # running channel max
                pltpu.VMEM((2 * KSIZE, L), jnp.float32),   # packed shifted planes
            ],
        ),
        compiler_params=pltpu.CompilerParams(
            dimension_semantics=("parallel", "arbitrary"),
        ),
    )(wtab, masks, x_flat)

    return out.reshape(B, 1, H, W)


def _reference(x, weight):
    avg = jnp.mean(x, axis=1, keepdims=True)
    mx = jnp.max(x, axis=1, keepdims=True)
    cat = jnp.concatenate([avg, mx], axis=1)
    y = lax.conv_general_dilated(
        cat, weight, window_strides=(1, 1), padding=((PAD, PAD), (PAD, PAD)),
        dimension_numbers=("NCHW", "OIHW", "NCHW"))
    return jax.nn.sigmoid(y)


if __name__ == "__main__":
    key = jax.random.PRNGKey(0)
    kx, kw = jax.random.split(key)

    B, C, H, W = 2, 4, 16, 16
    x = jax.random.normal(kx, (B, C, H, W), dtype=jnp.float32)

    # Deterministic conv weight (kaiming-uniform-like), shape (1, 2, 7, 7).
    fan_in = 2 * KSIZE * KSIZE
    bound = 1.0 / math.sqrt(fan_in)
    weight = jax.random.uniform(kw, (1, 2, KSIZE, KSIZE), dtype=jnp.float32,
                                minval=-bound, maxval=bound)

    # float32 path
    out = jax.block_until_ready(spatial_attention(x, weight))
    ref = jax.block_until_ready(_reference(x, weight))
    assert out.shape == (B, 1, H, W)
    np.testing.assert_allclose(np.asarray(out), np.asarray(ref), rtol=1e-5, atol=1e-5)

    # bf16 ingestion path (kernel streams bf16 from HBM, accumulates in f32)
    x_bf16 = x.astype(jnp.bfloat16)
    out_bf = jax.block_until_ready(spatial_attention(x_bf16, weight))
    ref_bf = jax.block_until_ready(_reference(x_bf16.astype(jnp.float32), weight))
    np.testing.assert_allclose(np.asarray(out_bf), np.asarray(ref_bf), rtol=1e-4, atol=1e-4)

    print("KERNEL_OK")
</pallas_src>

<mosaic_0001>
module attributes {stable_mosaic.version = 11 : i64} {
  func.func @_spatial_attention_kernel(%arg0: i32, %arg1: i32, %arg2: memref<14x7xf32, #tpu.memory_space<vmem>>, %arg3: memref<7x256xf32, #tpu.memory_space<vmem>>, %arg4: memref<1x4x256xf32, #tpu.memory_space<vmem>>, %arg5: memref<1x1x256xf32, #tpu.memory_space<vmem>>, %arg6: memref<1x256xf32, #tpu.memory_space<vmem>>, %arg7: memref<1x256xf32, #tpu.memory_space<vmem>>, %arg8: memref<14x384xf32, #tpu.memory_space<vmem>>) attributes {dimension_semantics = [#tpu.dimension_semantics<parallel>, #tpu.dimension_semantics<arbitrary>], iteration_bounds = array<i64: 2, 1>, scalar_prefetch = 0 : i64, scratch_operands = 3 : i64, tpu.core_type = #tpu.core_type<tc>, window_params = [{pipeline_mode = #tpu.pipeline_mode<synchronous>, transform_indices = @transform_0, window_bounds = array<i64: 14, 7>}, {pipeline_mode = #tpu.pipeline_mode<synchronous>, transform_indices = @transform_1, window_bounds = array<i64: 7, 256>}, {transform_indices = @transform_2, window_bounds = array<i64: 1, 4, 256>}, {transform_indices = @transform_3, window_bounds = array<i64: 1, 1, 256>}]} {
    %c0_i32 = arith.constant 0 : i32
    %0 = arith.cmpi eq, %arg1, %c0_i32 : i32
    %1 = arith.extui %0 : i1 to i32
    %c0_i32_0 = arith.constant 0 : i32
    %2 = arith.cmpi ne, %1, %c0_i32_0 : i32
    scf.if %2 {
      %cst_14 = arith.constant 0.000000e+00 : f32
      %18 = vector.broadcast %cst_14 : f32 to vector<1x256xf32>
      %c0_15 = arith.constant 0 : index
      %c0_16 = arith.constant 0 : index
      %19 = vector.load %arg6[%c0_15, %c0_16] : memref<1x256xf32, #tpu.memory_space<vmem>>, vector<1x256xf32>
      tpu.vector_store %arg6[%c0_15, %c0_16], %18 {strides = array<i32>} : memref<1x256xf32, #tpu.memory_space<vmem>>, vector<1x256xf32>,
      %cst_17 = arith.constant 0xFF800000 : f32
      %20 = vector.broadcast %cst_17 : f32 to vector<1x256xf32>
      %c0_18 = arith.constant 0 : index
      %c0_19 = arith.constant 0 : index
      %21 = vector.load %arg7[%c0_18, %c0_19] : memref<1x256xf32, #tpu.memory_space<vmem>>, vector<1x256xf32>
      tpu.vector_store %arg7[%c0_18, %c0_19], %20 {strides = array<i32>} : memref<1x256xf32, #tpu.memory_space<vmem>>, vector<1x256xf32>,
    } else {
    }
    %c0 = arith.constant 0 : index
    %c0_1 = arith.constant 0 : index
    %c0_2 = arith.constant 0 : index
    %3 = vector.load %arg4[%c0, %c0_1, %c0_2] : memref<1x4x256xf32, #tpu.memory_space<vmem>>, vector<1x4x256xf32>
    %4 = vector.shape_cast %3 : vector<1x4x256xf32> to vector<4x256xf32>
    %c0_3 = arith.constant 0 : index
    %c0_4 = arith.constant 0 : index
    %5 = vector.load %arg6[%c0_3, %c0_4] : memref<1x256xf32, #tpu.memory_space<vmem>>, vector<1x256xf32>
    %cst = arith.constant dense<0.000000e+00> : vector<256xf32>
    %6 = vector.multi_reduction <add>, %4, %cst [0] : vector<4x256xf32> to vector<256xf32>
    %7 = vector.shape_cast %6 : vector<256xf32> to vector<1x256xf32>
    %8 = arith.addf %5, %7 : vector<1x256xf32>
    %c0_5 = arith.constant 0 : index
    %c0_6 = arith.constant 0 : index
    %9 = vector.load %arg6[%c0_5, %c0_6] : memref<1x256xf32, #tpu.memory_space<vmem>>, vector<1x256xf32>
    tpu.vector_store %arg6[%c0_5, %c0_6], %8 {strides = array<i32>} : memref<1x256xf32, #tpu.memory_space<vmem>>, vector<1x256xf32>,
    %c0_7 = arith.constant 0 : index
    %c0_8 = arith.constant 0 : index
    %10 = vector.load %arg7[%c0_7, %c0_8] : memref<1x256xf32, #tpu.memory_space<vmem>>, vector<1x256xf32>
    %cst_9 = arith.constant dense<0xFF800000> : vector<256xf32>
    %11 = vector.multi_reduction <maximumf>, %4, %cst_9 [0] : vector<4x256xf32> to vector<256xf32>
    %12 = vector.shape_cast %11 : vector<256xf32> to vector<1x256xf32>
    %13 = arith.maximumf %10, %12 : vector<1x256xf32>
    %c0_10 = arith.constant 0 : index
    %c0_11 = arith.constant 0 : index
    %14 = vector.load %arg7[%c0_10, %c0_11] : memref<1x256xf32, #tpu.memory_space<vmem>>, vector<1x256xf32>
    tpu.vector_store %arg7[%c0_10, %c0_11], %13 {strides = array<i32>} : memref<1x256xf32, #tpu.memory_space<vmem>>, vector<1x256xf32>,
    %c0_i32_12 = arith.constant 0 : i32
    %15 = arith.cmpi eq, %arg1, %c0_i32_12 : i32
    %16 = arith.extui %15 : i1 to i32
    %c0_i32_13 = arith.constant 0 : i32
    %17 = arith.cmpi ne, %16, %c0_i32_13 : i32
    scf.if %17 {
      %cst_14 = arith.constant 0.000000e+00 : f32
      %18 = vector.broadcast %cst_14 : f32 to vector<14x384xf32>
      %c0_15 = arith.constant 0 : index
      %c0_16 = arith.constant 0 : index
      %19 = vector.load %arg8[%c0_15, %c0_16] : memref<14x384xf32, #tpu.memory_space<vmem>>, vector<14x384xf32>
      tpu.vector_store %arg8[%c0_15, %c0_16], %18 {strides = array<i32>} : memref<14x384xf32, #tpu.memory_space<vmem>>, vector<14x384xf32>,
      %c0_17 = arith.constant 0 : index
      %c0_18 = arith.constant 0 : index
      %20 = vector.load %arg6[%c0_17, %c0_18] : memref<1x256xf32, #tpu.memory_space<vmem>>, vector<1x256xf32>
      %c0_19 = arith.constant 0 : index
      %c51 = arith.constant 51 : index
      %21 = vector.load %arg8[%c0_19, %c51] : memref<14x384xf32, #tpu.memory_space<vmem>>, vector<1x256xf32>
      tpu.vector_store %arg8[%c0_19, %c51], %20 {strides = array<i32>} : memref<14x384xf32, #tpu.memory_space<vmem>>, vector<1x256xf32>,
      %c0_20 = arith.constant 0 : index
      %c0_21 = arith.constant 0 : index
      %22 = vector.load %arg7[%c0_20, %c0_21] : memref<1x256xf32, #tpu.memory_space<vmem>>, vector<1x256xf32>
      %c7 = arith.constant 7 : index
      %c51_22 = arith.constant 51 : index
      %23 = vector.load %arg8[%c7, %c51_22] : memref<14x384xf32, #tpu.memory_space<vmem>>, vector<1x256xf32>
      tpu.vector_store %arg8[%c7, %c51_22], %22 {strides = array<i32>} : memref<14x384xf32, #tpu.memory_space<vmem>>, vector<1x256xf32>,
      %c0_23 = arith.constant 0 : index
      %c0_24 = arith.constant 0 : index
      %24 = vector.load %arg6[%c0_23, %c0_24] : memref<1x256xf32, #tpu.memory_space<vmem>>, vector<1x256xf32>
      %c1 = arith.constant 1 : index
      %c35 = arith.constant 35 : index
      %25 = vector.load %arg8[%c1, %c35] : memref<14x384xf32, #tpu.memory_space<vmem>>, vector<1x256xf32>
      tpu.vector_store %arg8[%c1, %c35], %24 {strides = array<i32>} : memref<14x384xf32, #tpu.memory_space<vmem>>, vector<1x256xf32>,
      %c0_25 = arith.constant 0 : index
      %c0_26 = arith.constant 0 : index
      %26 = vector.load %arg7[%c0_25, %c0_26] : memref<1x256xf32, #tpu.memory_space<vmem>>, vector<1x256xf32>
      %c8 = arith.constant 8 : index
      %c35_27 = arith.constant 35 : index
      %27 = vector.load %arg8[%c8, %c35_27] : memref<14x384xf32, #tpu.memory_space<vmem>>, vector<1x256xf32>
      tpu.vector_store %arg8[%c8, %c35_27], %26 {strides = array<i32>} : memref<14x384xf32, #tpu.memory_space<vmem>>, vector<1x256xf32>,
      %c0_28 = arith.constant 0 : index
      %c0_29 = arith.constant 0 : index
      %28 = vector.load %arg6[%c0_28, %c0_29] : memref<1x256xf32, #tpu.memory_space<vmem>>, vector<1x256xf32>
      %c2 = arith.constant 2 : index
      %c19 = arith.constant 19 : index
      %29 = vector.load %arg8[%c2, %c19] : memref<14x384xf32, #tpu.memory_space<vmem>>, vector<1x256xf32>
      tpu.vector_store %arg8[%c2, %c19], %28 {strides = array<i32>} : memref<14x384xf32, #tpu.memory_space<vmem>>, vector<1x256xf32>,
      %c0_30 = arith.constant 0 : index
      %c0_31 = arith.constant 0 : index
      %30 = vector.load %arg7[%c0_30, %c0_31] : memref<1x256xf32, #tpu.memory_space<vmem>>, vector<1x256xf32>
      %c9 = arith.constant 9 : index
      %c19_32 = arith.constant 19 : index
      %31 = vector.load %arg8[%c9, %c19_32] : memref<14x384xf32, #tpu.memory_space<vmem>>, vector<1x256xf32>
      tpu.vector_store %arg8[%c9, %c19_32], %30 {strides = array<i32>} : memref<14x384xf32, #tpu.memory_space<vmem>>, vector<1x256xf32>,
      %c0_33 = arith.constant 0 : index
      %c0_34 = arith.constant 0 : index
      %32 = vector.load %arg6[%c0_33, %c0_34] : memref<1x256xf32, #tpu.memory_space<vmem>>, vector<1x256xf32>
      %c3 = arith.constant 3 : index
      %c3_35 = arith.constant 3 : index
      %33 = vector.load %arg8[%c3, %c3_35] : memref<14x384xf32, #tpu.memory_space<vmem>>, vector<1x256xf32>
      tpu.vector_store %arg8[%c3, %c3_35], %32 {strides = array<i32>} : memref<14x384xf32, #tpu.memory_space<vmem>>, vector<1x256xf32>,
      %c0_36 = arith.constant 0 : index
      %c0_37 = arith.constant 0 : index
      %34 = vector.load %arg7[%c0_36, %c0_37] : memref<1x256xf32, #tpu.memory_space<vmem>>, vector<1x256xf32>
      %c10 = arith.constant 10 : index
      %c3_38 = arith.constant 3 : index
      %35 = vector.load %arg8[%c10, %c3_38] : memref<14x384xf32, #tpu.memory_space<vmem>>, vector<1x256xf32>
      tpu.vector_store %arg8[%c10, %c3_38], %34 {strides = array<i32>} : memref<14x384xf32, #tpu.memory_space<vmem>>, vector<1x256xf32>,
      %c0_39 = arith.constant 0 : index
      %c13 = arith.constant 13 : index
      %36 = vector.load %arg6[%c0_39, %c13] : memref<1x256xf32, #tpu.memory_space<vmem>>, vector<1x243xf32>
      %c4 = arith.constant 4 : index
      %c0_40 = arith.constant 0 : index
      %37 = vector.load %arg8[%c4, %c0_40] : memref<14x384xf32, #tpu.memory_space<vmem>>, vector<1x243xf32>
      tpu.vector_store %arg8[%c4, %c0_40], %36 {strides = array<i32>} : memref<14x384xf32, #tpu.memory_space<vmem>>, vector<1x243xf32>,
      %c0_41 = arith.constant 0 : index
      %c13_42 = arith.constant 13 : index
      %38 = vector.load %arg7[%c0_41, %c13_42] : memref<1x256xf32, #tpu.memory_space<vmem>>, vector<1x243xf32>
      %c11 = arith.constant 11 : index
      %c0_43 = arith.constant 0 : index
      %39 = vector.load %arg8[%c11, %c0_43] : memref<14x384xf32, #tpu.memory_space<vmem>>, vector<1x243xf32>
      tpu.vector_store %arg8[%c11, %c0_43], %38 {strides = array<i32>} : memref<14x384xf32, #tpu.memory_space<vmem>>, vector<1x243xf32>,
      %c0_44 = arith.constant 0 : index
      %c29 = arith.constant 29 : index
      %40 = vector.load %arg6[%c0_44, %c29] : memref<1x256xf32, #tpu.memory_space<vmem>>, vector<1x227xf32>
      %c5 = arith.constant 5 : index
      %c0_45 = arith.constant 0 : index
      %41 = vector.load %arg8[%c5, %c0_45] : memref<14x384xf32, #tpu.memory_space<vmem>>, vector<1x227xf32>
      tpu.vector_store %arg8[%c5, %c0_45], %40 {strides = array<i32>} : memref<14x384xf32, #tpu.memory_space<vmem>>, vector<1x227xf32>,
      %c0_46 = arith.constant 0 : index
      %c29_47 = arith.constant 29 : index
      %42 = vector.load %arg7[%c0_46, %c29_47] : memref<1x256xf32, #tpu.memory_space<vmem>>, vector<1x227xf32>
      %c12 = arith.constant 12 : index
      %c0_48 = arith.constant 0 : index
      %43 = vector.load %arg8[%c12, %c0_48] : memref<14x384xf32, #tpu.memory_space<vmem>>, vector<1x227xf32>
      tpu.vector_store %arg8[%c12, %c0_48], %42 {strides = array<i32>} : memref<14x384xf32, #tpu.memory_space<vmem>>, vector<1x227xf32>,
      %c0_49 = arith.constant 0 : index
      %c45 = arith.constant 45 : index
      %44 = vector.load %arg6[%c0_49, %c45] : memref<1x256xf32, #tpu.memory_space<vmem>>, vector<1x211xf32>
      %c6 = arith.constant 6 : index
      %c0_50 = arith.constant 0 : index
      %45 = vector.load %arg8[%c6, %c0_50] : memref<14x384xf32, #tpu.memory_space<vmem>>, vector<1x211xf32>
      tpu.vector_store %arg8[%c6, %c0_50], %44 {strides = array<i32>} : memref<14x384xf32, #tpu.memory_space<vmem>>, vector<1x211xf32>,
      %c0_51 = arith.constant 0 : index
      %c45_52 = arith.constant 45 : index
      %46 = vector.load %arg7[%c0_51, %c45_52] : memref<1x256xf32, #tpu.memory_space<vmem>>, vector<1x211xf32>
      %c13_53 = arith.constant 13 : index
      %c0_54 = arith.constant 0 : index
      %47 = vector.load %arg8[%c13_53, %c0_54] : memref<14x384xf32, #tpu.memory_space<vmem>>, vector<1x211xf32>
      tpu.vector_store %arg8[%c13_53, %c0_54], %46 {strides = array<i32>} : memref<14x384xf32, #tpu.memory_space<vmem>>, vector<1x211xf32>,
      %cst_55 = arith.constant 0.000000e+00 : f32
      %48 = vector.broadcast %cst_55 : f32 to vector<1x256xf32>
      %c0_56 = arith.constant 0 : index
      %c0_57 = arith.constant 0 : index
      %49 = vector.load %arg8[%c0_56, %c0_57] : memref<14x384xf32, #tpu.memory_space<vmem>>, vector<14x256xf32>
      %c0_58 = arith.constant 0 : index
      %c0_59 = arith.constant 0 : index
      %50 = vector.load %arg2[%c0_58, %c0_59] : memref<14x7xf32, #tpu.memory_space<vmem>>, vector<14x1xf32>
      %51 = vector.broadcast %50 : vector<14x1xf32> to vector<14x256xf32>
      %52 = arith.mulf %49, %51 : vector<14x256xf32>
      %cst_60 = arith.constant dense<0.000000e+00> : vector<256xf32>
      %53 = vector.multi_reduction <add>, %52, %cst_60 [0] : vector<14x256xf32> to vector<256xf32>
      %54 = vector.shape_cast %53 : vector<256xf32> to vector<1x256xf32>
      %c0_61 = arith.constant 0 : index
      %c0_62 = arith.constant 0 : index
      %55 = vector.load %arg3[%c0_61, %c0_62] : memref<7x256xf32, #tpu.memory_space<vmem>>, vector<1x256xf32>
      %56 = arith.mulf %54, %55 : vector<1x256xf32>
      %57 = arith.addf %48, %56 : vector<1x256xf32>
      %c0_63 = arith.constant 0 : index
      %c1_64 = arith.constant 1 : index
      %58 = vector.load %arg8[%c0_63, %c1_64] : memref<14x384xf32, #tpu.memory_space<vmem>>, vector<14x256xf32>
      %c0_65 = arith.constant 0 : index
      %c1_66 = arith.constant 1 : index
      %59 = vector.load %arg2[%c0_65, %c1_66] : memref<14x7xf32, #tpu.memory_space<vmem>>, vector<14x1xf32>
      %60 = vector.broadcast %59 : vector<14x1xf32> to vector<14x256xf32>
      %61 = arith.mulf %58, %60 : vector<14x256xf32>
      %cst_67 = arith.constant dense<0.000000e+00> : vector<256xf32>
      %62 = vector.multi_reduction <add>, %61, %cst_67 [0] : vector<14x256xf32> to vector<256xf32>
      %63 = vector.shape_cast %62 : vector<256xf32> to vector<1x256xf32>
      %c1_68 = arith.constant 1 : index
      %c0_69 = arith.constant 0 : index
      %64 = vector.load %arg3[%c1_68, %c0_69] : memref<7x256xf32, #tpu.memory_space<vmem>>, vector<1x256xf32>
      %65 = arith.mulf %63, %64 : vector<1x256xf32>
      %66 = arith.addf %57, %65 : vector<1x256xf32>
      %c0_70 = arith.constant 0 : index
      %c2_71 = arith.constant 2 : index
      %67 = vector.load %arg8[%c0_70, %c2_71] : memref<14x384xf32, #tpu.memory_space<vmem>>, vector<14x256xf32>
      %c0_72 = arith.constant 0 : index
      %c2_73 = arith.constant 2 : index
      %68 = vector.load %arg2[%c0_72, %c2_73] : memref<14x7xf32, #tpu.memory_space<vmem>>, vector<14x1xf32>
      %69 = vector.broadcast %68 : vector<14x1xf32> to vector<14x256xf32>
      %70 = arith.mulf %67, %69 : vector<14x256xf32>
      %cst_74 = arith.constant dense<0.000000e+00> : vector<256xf32>
      %71 = vector.multi_reduction <add>, %70, %cst_74 [0] : vector<14x256xf32> to vector<256xf32>
      %72 = vector.shape_cast %71 : vector<256xf32> to vector<1x256xf32>
      %c2_75 = arith.constant 2 : index
      %c0_76 = arith.constant 0 : index
      %73 = vector.load %arg3[%c2_75, %c0_76] : memref<7x256xf32, #tpu.memory_space<vmem>>, vector<1x256xf32>
      %74 = arith.mulf %72, %73 : vector<1x256xf32>
      %75 = arith.addf %66, %74 : vector<1x256xf32>
      %c0_77 = arith.constant 0 : index
      %c3_78 = arith.constant 3 : index
      %76 = vector.load %arg8[%c0_77, %c3_78] : memref<14x384xf32, #tpu.memory_space<vmem>>, vector<14x256xf32>
      %c0_79 = arith.constant 0 : index
      %c3_80 = arith.constant 3 : index
      %77 = vector.load %arg2[%c0_79, %c3_80] : memref<14x7xf32, #tpu.memory_space<vmem>>, vector<14x1xf32>
      %78 = vector.broadcast %77 : vector<14x1xf32> to vector<14x256xf32>
      %79 = arith.mulf %76, %78 : vector<14x256xf32>
      %cst_81 = arith.constant dense<0.000000e+00> : vector<256xf32>
      %80 = vector.multi_reduction <add>, %79, %cst_81 [0] : vector<14x256xf32> to vector<256xf32>
      %81 = vector.shape_cast %80 : vector<256xf32> to vector<1x256xf32>
      %c3_82 = arith.constant 3 : index
      %c0_83 = arith.constant 0 : index
      %82 = vector.load %arg3[%c3_82, %c0_83] : memref<7x256xf32, #tpu.memory_space<vmem>>, vector<1x256xf32>
      %83 = arith.mulf %81, %82 : vector<1x256xf32>
      %84 = arith.addf %75, %83 : vector<1x256xf32>
      %c0_84 = arith.constant 0 : index
      %c4_85 = arith.constant 4 : index
      %85 = vector.load %arg8[%c0_84, %c4_85] : memref<14x384xf32, #tpu.memory_space<vmem>>, vector<14x256xf32>
      %c0_86 = arith.constant 0 : index
      %c4_87 = arith.constant 4 : index
      %86 = vector.load %arg2[%c0_86, %c4_87] : memref<14x7xf32, #tpu.memory_space<vmem>>, vector<14x1xf32>
      %87 = vector.broadcast %86 : vector<14x1xf32> to vector<14x256xf32>
      %88 = arith.mulf %85, %87 : vector<14x256xf32>
      %cst_88 = arith.constant dense<0.000000e+00> : vector<256xf32>
      %89 = vector.multi_reduction <add>, %88, %cst_88 [0] : vector<14x256xf32> to vector<256xf32>
      %90 = vector.shape_cast %89 : vector<256xf32> to vector<1x256xf32>
      %c4_89 = arith.constant 4 : index
      %c0_90 = arith.constant 0 : index
      %91 = vector.load %arg3[%c4_89, %c0_90] : memref<7x256xf32, #tpu.memory_space<vmem>>, vector<1x256xf32>
      %92 = arith.mulf %90, %91 : vector<1x256xf32>
      %93 = arith.addf %84, %92 : vector<1x256xf32>
      %c0_91 = arith.constant 0 : index
      %c5_92 = arith.constant 5 : index
      %94 = vector.load %arg8[%c0_91, %c5_92] : memref<14x384xf32, #tpu.memory_space<vmem>>, vector<14x256xf32>
      %c0_93 = arith.constant 0 : index
      %c5_94 = arith.constant 5 : index
      %95 = vector.load %arg2[%c0_93, %c5_94] : memref<14x7xf32, #tpu.memory_space<vmem>>, vector<14x1xf32>
      %96 = vector.broadcast %95 : vector<14x1xf32> to vector<14x256xf32>
      %97 = arith.mulf %94, %96 : vector<14x256xf32>
      %cst_95 = arith.constant dense<0.000000e+00> : vector<256xf32>
      %98 = vector.multi_reduction <add>, %97, %cst_95 [0] : vector<14x256xf32> to vector<256xf32>
      %99 = vector.shape_cast %98 : vector<256xf32> to vector<1x256xf32>
      %c5_96 = arith.constant 5 : index
      %c0_97 = arith.constant 0 : index
      %100 = vector.load %arg3[%c5_96, %c0_97] : memref<7x256xf32, #tpu.memory_space<vmem>>, vector<1x256xf32>
      %101 = arith.mulf %99, %100 : vector<1x256xf32>
      %102 = arith.addf %93, %101 : vector<1x256xf32>
      %c0_98 = arith.constant 0 : index
      %c6_99 = arith.constant 6 : index
      %103 = vector.load %arg8[%c0_98, %c6_99] : memref<14x384xf32, #tpu.memory_space<vmem>>, vector<14x256xf32>
      %c0_100 = arith.constant 0 : index
      %c6_101 = arith.constant 6 : index
      %104 = vector.load %arg2[%c0_100, %c6_101] : memref<14x7xf32, #tpu.memory_space<vmem>>, vector<14x1xf32>
      %105 = vector.broadcast %104 : vector<14x1xf32> to vector<14x256xf32>
      %106 = arith.mulf %103, %105 : vector<14x256xf32>
      %cst_102 = arith.constant dense<0.000000e+00> : vector<256xf32>
      %107 = vector.multi_reduction <add>, %106, %cst_102 [0] : vector<14x256xf32> to vector<256xf32>
      %108 = vector.shape_cast %107 : vector<256xf32> to vector<1x256xf32>
      %c6_103 = arith.constant 6 : index
      %c0_104 = arith.constant 0 : index
      %109 = vector.load %arg3[%c6_103, %c0_104] : memref<7x256xf32, #tpu.memory_space<vmem>>, vector<1x256xf32>
      %110 = arith.mulf %108, %109 : vector<1x256xf32>
      %111 = arith.addf %102, %110 : vector<1x256xf32>
      %112 = arith.negf %111 : vector<1x256xf32>
      %113 = math.exp %112 : vector<1x256xf32>
      %cst_105 = arith.constant 1.000000e+00 : f32
      %114 = vector.broadcast %cst_105 : f32 to vector<1x256xf32>
      %115 = arith.addf %114, %113 : vector<1x256xf32>
      %116 = arith.divf %114, %115 : vector<1x256xf32>
      %c0_106 = arith.constant 0 : index
      %c0_107 = arith.constant 0 : index
      %c0_108 = arith.constant 0 : index
      %117 = vector.load %arg5[%c0_106, %c0_107, %c0_108] : memref<1x1x256xf32, #tpu.memory_space<vmem>>, vector<1x1x256xf32>
      %118 = vector.shape_cast %117 : vector<1x1x256xf32> to vector<1x256xf32>
      %119 = vector.shape_cast %116 : vector<1x256xf32> to vector<1x1x256xf32>
      tpu.vector_store %arg5[%c0_106, %c0_107, %c0_108], %119 {strides = array<i32>} : memref<1x1x256xf32, #tpu.memory_space<vmem>>, vector<1x1x256xf32>,
    } else {
    }
    return
  }
  func.func @transform_0(%arg0: i32, %arg1: i32) -> (i32, i32) {
    %c0_i32 = arith.constant 0 : i32
    %c0_i32_0 = arith.constant 0 : i32
    %c0_i32_1 = arith.constant 0 : i32
    return %c0_i32, %c0_i32_0 : i32, i32
  }
  func.func @transform_1(%arg0: i32, %arg1: i32) -> (i32, i32) {
    %c0_i32 = arith.constant 0 : i32
    %c0_i32_0 = arith.constant 0 : i32
    %c0_i32_1 = arith.constant 0 : i32
    return %c0_i32, %c0_i32_0 : i32, i32
  }
  func.func @transform_2(%arg0: i32, %arg1: i32) -> (i32, i32, i32) {
    %c0_i32 = arith.constant 0 : i32
    %c0_i32_0 = arith.constant 0 : i32
    return %arg0, %arg1, %c0_i32 : i32, i32, i32
  }
  func.func @transform_3(%arg0: i32, %arg1: i32) -> (i32, i32, i32) {
    %c0_i32 = arith.constant 0 : i32
    %c0_i32_0 = arith.constant 0 : i32
    %c0_i32_1 = arith.constant 0 : i32
    return %arg0, %c0_i32, %c0_i32_0 : i32, i32, i32
  }
}

</mosaic_0001>

<bundles_post_ra>
// kernel: tpu_custom_call.1
= control target key start
LH: loop header
LB: loop body
LE: loop exit
PB: predicated region body
PF: predicated region fallthrough
CT: control target
= control target key end

     0   :  { %8 = vsyncpa [#allocation6], 0  ;;  %s1995_s0 = inlined_call_operand.vmem [shape: f32[14,7], index: 0, kind: input, shape index: {}]   ;;  %s1996_s1 = inlined_call_operand.vmem [shape: f32[7,256], index: 1, kind: input, shape index: {}]   ;;  %s1997_s2 = inlined_call_operand.hbm [shape: f32[2,4,256], index: 2, kind: input, shape index: {}]   ;;  %s1998_s3 = inlined_call_operand.hbm [shape: f32[2,1,256], index: 3, kind: output, shape index: {}]  }
   0x1   :  { %10 = vsyncpa [#allocation6 + $0x1], 0 }
   0x2   :  { %11 = vsyncpa [#allocation7], 0 }
   0x3   :  { %13 = vsyncpa [#allocation7 + $0x1], 0  ;;  %s1439_s12 = smov 0   ;;  %s1441_s13 = smov 0  }
   0x4   :  { %s1443_s14 = smov 0   ;;  %s1445_s15 = smov 0  }
   0x5   :  { %s1447_s16 = smov 0   ;;  %s1449_s17 = smov 0  }
   0x6 LB: > { %s1142_s18 = sadd.s32 4294967295, %s1387_s17   ;;  %s1143_s19 = sadd.s32 4294967294, %s1387_s17   ;;  %s1387_s17 = sphi %s1449_s17, %s19_s17   ;;  %s1383_s16 = sphi %s1447_s16, %s2032_s16   ;;  %s1379_s15 = sphi %s1445_s15, %s2031_s15   ;;  %s1375_s14 = sphi %s1443_s14, %s2030_s14   ;;  %s1371_s13 = sphi %s1441_s13, %s2029_s13   ;;  %s1367_s12 = sphi %s1439_s12, %s2028_s12  }
   0x7   : > { %s31_s20 = sadd.s32 1, %s1383_s16  ;;  %s82_s21 = sadd.s32 1, %s1375_s14 }
   0x8   : > { %p33_p0 = scmp.ge.s32.totalorder %s31_s20, 2  ;;  %p89_p1 = scmp.ne.s32.totalorder %s1375_s14, %s1371_s13 }
   0x9   : > { %p90_p2 = scmp.eq.s32.totalorder %s1387_s17, 0  ;;  %p95_p3 = scmp.ne.s32.totalorder %s1371_s13, %s1367_s12 }
   0xa   : > { %s2034_s20 = smov (%p33_p0, %s31_s20), 0  ;;  %p96_p5 = scmp.eq.s32.totalorder %s1142_s18, 0 }
   0xb   : > { %p1480_p4 = por %p90_p2, %p89_p1  ;;  %s77_s23 = ssub.s32 %s1383_s16, %s2034_s20 }
   0xc   : > { %p119_p6 = scmp.eq.s32.totalorder %s1142_s18, 1  ;;  %p80_p7 = scmp.eq.s32.totalorder %s77_s23, 0 }
   0xd   : > { %p1486_p8 = por %p96_p5, %p95_p3  ;;  %p125_p10 = scmp.eq.s32.totalorder %s1143_s19, 1 }
   0xe   : > { %p1490_p9 = por %p119_p6, %p89_p1  ;;  %p1179_p13 = scmp.lt.s32.totalorder %s1387_s17, 2 }
   0xf   : > { %s1495_s26 = scalar_select %p80_p7, %s1375_s14, %s82_s21  }
  0x10   : > { %p1497_p11 = por %p125_p10, %p95_p3  ;;  %s151_s28 = sand.u32 1, %s1375_s14  }
  0x11   : > { %s1146_s29 = sshll.u32 %s151_s28, 3  ;;  %s1165_s30 = sshll.u32 %s1383_s16, 7 }
  0x12   : > { %s2004_s27 = scalar_select %p1497_p11, 1, 0 }
  0x13   : > { %s163_s6 = scalar_lea.hbm %s1997_s2, %s1165_s30  ;;  %s155_s7 = scalar_lea.vmem [#allocation5], %s1146_s29 }
  0x14   : > { %s165_s8 = sshll.u32 %s155_s7, 4  ;;  %p1510_p0 = pnand %p1179_p13, %p1480_p4  ;;  %s166_s8 = int_to_ptr.vmem [resolvable:$true] %s165_s8 }
  0x15   : > { %p1149_p1 = scmp.ge.s32.totalorder %s1387_s17, 1  ;;  %p170_p2 = scmp.lt.s32.totalorder %s1387_s17, 3 }
  0x16   : > { %s152_s10 = scalar_lea.sflag [#allocation6], %s151_s28  ;;  %p1281_p3 = pneg %p1510_p0 }
  0x17   : > { %s1292_s11 = scalar_lea.vmem %s166_s8, 128  ;;  %s1389_s18 = smov [#allocation5]  }
  0x18   : > { %p1293_p5 = scmp.ne.s32.totalorder %s166_s8, %s1292_s11  ;;  %s1297_s19 = sshll.u32 %s1389_s18, 4  ;;  %s1298_s19 = int_to_ptr.vmem [resolvable:$false] %s1297_s19 }
  0x19   : > { %s1299_s21 = scalar_lea.vmem %s1298_s19, 256  ;;  %p1300_p10 = scmp.lt.s32.totalorder %s166_s8, %s1298_s19 }
  0x1a   : > { %p1295_p6 = pnand %p1293_p5, %p1281_p3  ;;  %p1301_p12 = scmp.lt.s32.totalorder %s1299_s21, %s1292_s11 }
  0x1c   : > { %p1296_p7 = pneg %p1295_p6  ;;  %p1302_p4 = por %p1301_p12, %p1300_p10 }
  0x1e   : > { %p1303_p13 = pnand %p1302_p4, %p1296_p7 }
  0x20   : > { %1306 = shalt.err (!%p1303_p13)
}
  0x21   : > { %1174 = dma.hbm_to_vmem [thread:$0]  (!%p1510_p0), %s163_s6, 128, %s166_s8, %s152_s10  }
  0x22   : > { %p171_p11 = pnand %p1149_p1, %p170_p2 }
  0x23   : > { %s1525_s22 = sand.u32 (!%p171_p11), 1, %s1371_s13  }
  0x24   : > { %174 = sbr.rel (%p171_p11) target bundleno = 471 (0x1d7), region = 32  ;;  %s1150_s23 = sshll.u32 (!%p171_p11), %s1525_s22, 3 }
  0x25   : > { %s177_s28 = scalar_lea.sflag (!%p171_p11), [#allocation6], %s1525_s22  ;;  %s180_s29 = scalar_lea.vmem (!%p171_p11), [#allocation5], %s1150_s23 }
  0x29   : > { %1358 = dma.done.wait (%p1486_p8), %s177_s28, 128  }
  0x2a   : > { %1360 = vsyncadd (%p1486_p8), %s177_s28, 4294967168  ;;  %v207_v0 = vlaneseq  ;;  %v1390_v1 = vmov 1   ;;  %v1391_v2 = vmov 0.0   ;;  %v1392_v4 = vmov -inf   ;;  %v1545_v5 = vld [vmem:[%s1995_s0 + $0x8] sm:$0x3f] }
  0x2b   : > { %1258 = vset.pattern.permute.xlu1 %v1390_v1  ;;  %1257 = vset.pattern.permute.xlu0 %v1390_v1  ;;  %295 = vst [vmem:[#allocation4] sm:$0xff] %v1391_v2  ;;  %296 = vst [vmem:[#allocation4 + $0x8] sm:$0xff] %v1391_v2  ;;  %vm218_vm1 = vcmask 1043456   ;;  %v1550_v6 = vld [vmem:[%s1995_s0] sm:$0xff]  ;;  %v1393_v19 = vmov 2   ;;  %v1395_v36 = vmov 3  }
  0x2c   : > { %297 = vst [vmem:[#allocation4 + $0x10] sm:$0xff] %v1391_v2  ;;  %298 = vst [vmem:[#allocation4 + $0x18] sm:$0x3f] %v1391_v2  ;;  %vm1534_vm0 = vcmp.lt.s32.totalorder %v207_v0, 256  ;;  %v213_v7 = vld [vmem:[%s180_s29] sm:$0xff]  ;;  %529 = vperm.xlu1 %1258, %v1545_v5   ;;  %525 = vperm.xlu0 %1257, %v1550_v6   ;;  %v1556_v31 = vshrl.u32 %v207_v0, 7 }
  0x2d   : > { %299 = vst [vmem:[#allocation4 + $0x20] sm:$0x3f] %v1391_v2  ;;  %300 = vst [vmem:[#allocation4 + $0x28] sm:$0x3f] %v1391_v2  ;;  %v216_v8 = vcombine.high %v213_v7, %v213_v7  ;;  %v219_v9 = vsel %vm218_vm1, %v213_v7, 0.0  ;;  %v258_v10 = vsel %vm218_vm1, %v213_v7, -inf }
  0x2e   : > { %211 = vst.msk [vmem:[#allocation2] sm:$0x3] %vm1534_vm0, %v1391_v2  ;;  %212 = vst.msk [vmem:[#allocation3] sm:$0x3] %vm1534_vm0, %v1392_v4  ;;  %v220_v11 = vrot.slane %v219_v9, 4  ;;  %v259_v12 = vrot.slane %v258_v10, 4 }
  0x2f   : > { %v226_v13 = vsel %vm218_vm1, %v216_v8, 0.0  ;;  %v265_v14 = vsel %vm218_vm1, %v216_v8, -inf  ;;  %v1394_v20 = vmov 1966171168   ;;  %s1396_s6 = smov 35   ;;  %s1397_s7 = smov 51  }
  0x30   : > { %v221_v15 = vadd.f32 %v220_v11, %v219_v9  ;;  %v227_v16 = vrot.slane %v226_v13, 4  ;;  %v260_v17 = vmax.f32 %v258_v10, %v259_v12  ;;  %v266_v18 = vrot.slane %v265_v14, 4  ;;  %1259 = vset.pattern.permute.xlu1 %v1393_v19  ;;  %1260 = vset.pattern.permute.xlu0 %v1393_v19  ;;  %s1398_s8 = smov 19   ;;  %s1399_s9 = smov 3  }
  0x31   : > { %v237_v21 = vunpack.c.l.s4 %v1394_v20  ;;  %607 = vperm.xlu1 %1259, %v1550_v6   ;;  %s1400_s10 = smov 115   ;;  %s1401_s11 = smov 99   ;;  %v1403_v8 = vmov 4   ;;  %v1576_v9 = vsub.s32 0, %v1556_v31  ;;  %v1404_v11 = vmov 5  }
  0x32   : > { %v222_v22 = vrot.slane %v221_v15, 2  ;;  %v228_v23 = vadd.f32 %v227_v16, %v226_v13  ;;  %v261_v24 = vrot.slane %v260_v17, 2  ;;  %v267_v25 = vmax.f32 %v265_v14, %v266_v18  ;;  %s1402_s18 = smov 83   ;;  %v1152_v10 = vld [vmem:[%s1996_s1 + $0x1] ss:$8 sm:$0x3] }
  0x33   : > { %v238_v30 = vunpack.c.0.s8 %v237_v21  ;;  %v574_v12 = vrot.slane %v1152_v10, %v1576_v9  ;;  %v1153_v13 = vld [vmem:[%s1996_s1 + $0x2] ss:$8 sm:$0x3]  ;;  %s1405_s29 = smov 1   ;;  %v1406_v16 = vmov 0   ;;  %s1408_s4 = smov 2  }
  0x34   : > { %v223_v26 = vadd.f32 %v222_v22, %v221_v15  ;;  %v229_v27 = vrot.slane %v228_v23, 2  ;;  %v262_v28 = vmax.f32 %v260_v17, %v261_v24  ;;  %v268_v29 = vrot.slane %v267_v25, 2  ;;  %v1154_v15 = vld [vmem:[%s1996_s1 + $0x3] ss:$8 sm:$0x3]  ;;  %s1410_s19 = smov 5  }
  0x35   : > { %1261 = vset.pattern.permute.xlu1 %v1395_v36  ;;  %v1559_v42 = vsub.s32 %v238_v30, %v1556_v31  ;;  %v214_v48 = vld [vmem:[#allocation2] sm:$0x3]  ;;  %v257_v49 = vld [vmem:[#allocation3] sm:$0x3]  ;;  %v656_v14 = vrot.slane %v1153_v13, %v1576_v9  ;;  %v1407_v17 = vmov 6   ;;  %v737_v18 = vrot.slane %v1154_v15, %v1576_v9  ;;  %s1411_s21 = smov 6  }
  0x36   : > { %v224_v32 = vrot.slane %v223_v26, 1  ;;  %v230_v33 = vadd.f32 %v229_v27, %v228_v23  ;;  %v263_v34 = vrot.slane %v262_v28, 1  ;;  %v269_v35 = vmax.f32 %v267_v25, %v268_v29  ;;  %v1155_v19 = vld [vmem:[%s1996_s1 + $0x4] ss:$8 sm:$0x3]  ;;  %s1413_s23 = smov 126  }
  0x37   : > { %v1598_v20 = vsub.s32 1, %v1556_v31  ;;  %v819_v21 = vrot.slane %v1155_v19, %v1576_v9  ;;  %v1156_v23 = vld [vmem:[%s1996_s1 + $0x5] ss:$8 sm:$0x3]  ;;  %vm1627_vm2 = vcmp.ge.s32.totalorder %v207_v0, 35  ;;  %vm1632_vm3 = vcmp.lt.s32.totalorder %v207_v0, 291 }
  0x38   : > { %v225_v37 = vadd.f32 %v224_v32, %v223_v26  ;;  %v231_v38 = vrot.slane %v230_v33, 1  ;;  %v264_v39 = vmax.f32 %v262_v28, %v263_v34  ;;  %v270_v40 = vrot.slane %v269_v35, 1  ;;  %v1157_v26 = vld [vmem:[%s1996_s1 + $0x6] ss:$8 sm:$0x3]  ;;  %vm334_vm7 = vmand %vm1627_vm2, %vm1632_vm3  ;;  %s1414_s28 = smov 125  }
  0x39   : > { %v578_v22 = vrot.slane %v1152_v10, %v1598_v20  ;;  %v901_v24 = vrot.slane %v1156_v23, %v1576_v9  ;;  %v660_v25 = vrot.slane %v1153_v13, %v1598_v20  ;;  %v983_v27 = vrot.slane %v1157_v26, %v1576_v9  ;;  %s1416_s24 = smov 123   ;;  %s1417_s30 = smov 122  }
  0x3a   : > { %v232_v41 = vadd.f32 %v231_v38, %v230_v33  ;;  %v271_v43 = vmax.f32 %v269_v35, %v270_v40  ;;  %v741_v28 = vrot.slane %v1154_v15, %v1598_v20  ;;  %v823_v29 = vrot.slane %v1155_v19, %v1598_v20 }
  0x3b   : > { %v905_v30 = vrot.slane %v1156_v23, %v1598_v20  ;;  %v987_v31 = vrot.slane %v1157_v26, %v1598_v20  ;;  %vm1637_vm4 = vcmp.ge.s32.totalorder %v207_v0, 51  ;;  %vm1642_vm5 = vcmp.lt.s32.totalorder %v207_v0, 307 }
  0x3c   : > { %v235_v44 = vcombine.low %v225_v37, %v232_v41  ;;  %v274_v45 = vcombine.low %v264_v39, %v271_v43  ;;  %vm329_vm6 = vcmask 285696   ;;  %vm306_vm8 = vcmask 416768   ;;  %vm311_vm9 = vmand %vm1637_vm4, %vm1642_vm5 }
  0x3d   : > { %vm1662_vm10 = vcmp.ge.s32.totalorder %v207_v0, 19  ;;  %vm1667_vm11 = vcmp.lt.s32.totalorder %v207_v0, 275  ;;  %vm353_vm12 = vcmask 154624   ;;  %vm1683_vm14 = vcmp.ge.s32.totalorder %v207_v0, 3 }
  0x3e   : > { %v242_v46 = vrot.slane %v235_v44, %v1559_v42  ;;  %v281_v47 = vrot.slane %v274_v45, %v1559_v42  ;;  %vm358_vm13 = vmand %vm1662_vm10, %vm1667_vm11  ;;  %vm381_vm15 = vcmp.lt.s32.totalorder %v207_v0, 259  ;;  %vm1999_vm1 = vcmask 23552  }
  0x3f   : > { %vm382_vm2 = vmand %vm1683_vm14, %vm381_vm15  ;;  %vm401_vm3 = vcmask 941056   ;;  %vm404_vm4 = vcmp.lt.s32.totalorder %v207_v0, 243  ;;  %vm424_vm5 = vcmask 809984   ;;  %vm559_vm10 = vcmask 5120  }
  0x40   : > { %v249_v50 = vrot.slane %v242_v46, %v1559_v42  ;;  %v288_v51 = vrot.slane %v281_v47, %v1559_v42  ;;  %vm641_vm11 = vcmask 13312   ;;  %vm620_vm14 = vcmask 1047568  }
  0x41   : > { %vm639_vm15 = vcmask 15360  }
  0x42   : > { %v251_v52 = vadd.f32 %v249_v50, %v214_v48  ;;  %v290_v53 = vmax.f32 %v257_v49, %v288_v51 }
  0x44   : > { %256 = vst.msk [vmem:[#allocation2] sm:$0x3] %vm1534_vm0, %v251_v52  ;;  %291 = vst.msk [vmem:[#allocation3] sm:$0x3] %vm1534_vm0, %v290_v53 }
  0x4b   : > { %v324_v54 = vld [vmem:[#allocation2] sm:$0x3]  ;;  %v338_v56 = vld [vmem:[#allocation3] sm:$0x3] }
  0x4c   : > { %v301_v55 = vld [vmem:[#allocation2] sm:$0x3]  ;;  %326 = vrot.lane.b32.xlu1 %v324_v54, %s1396_s6  ;;  %v314_v57 = vld [vmem:[#allocation3] sm:$0x3] }
  0x4d   : > { %303 = vrot.lane.b32.xlu0 %v301_v55, %s1397_s7  ;;  %v362_v58 = vld [vmem:[#allocation3] sm:$0x3]  ;;  %v348_v59 = vld [vmem:[#allocation2] sm:$0x3] }
  0x4e   : > { %v386_v60 = vld [vmem:[#allocation3] sm:$0x3]  ;;  %v372_v61 = vld [vmem:[#allocation2] sm:$0x3] }
  0x4f   : > { %v409_v62 = vld [vmem:[#allocation3] sm:$0x3]  ;;  %v396_v63 = vld [vmem:[#allocation2] sm:$0x3] }
  0x50   : > { %340 = vrot.lane.b32.xlu1 %v338_v56, %s1396_s6  ;;  %v432_v1 = vld [vmem:[#allocation3] sm:$0x3]  ;;  %v419_v2 = vld [vmem:[#allocation2] sm:$0x3]  ;;  %s1151_s6 = sshll.u32 %s1525_s22, 1 }
  0x51   : > { %316 = vrot.lane.b32.xlu0 %v314_v57, %s1397_s7  ;;  %v442_v4 = vld [vmem:[#allocation2] sm:$0x3]  ;;  %v455_v7 = vld [vmem:[#allocation3] sm:$0x3]  ;;  %s1166_s7 = sshll.u32 %s1379_s15, 5  ;;  %s1418_s15 = smov [#allocation8]  }
  0x54   : > { %364 = vrot.lane.b32.xlu1 %v362_v58, %s1398_s8 }
  0x55   : > { %350 = vrot.lane.b32.xlu0 %v348_v59, %s1398_s8  ;;  %s202_s8 = scalar_lea.vmem [#allocation8], %s1151_s6 }
  0x58   : > { %388 = vrot.lane.b32.xlu1 %v386_v60, %s1399_s9 }
  0x59   : > { %374 = vrot.lane.b32.xlu0 %v372_v61, %s1399_s9 }
  0x5c   : > { %411 = vrot.lane.b32.xlu1 %v409_v62, %s1400_s10 }
  0x5d   : > { %398 = vrot.lane.b32.xlu0 %v396_v63, %s1400_s10  ;;  %s1409_s10 = smov 4  }
  0x60   : > { %434 = vrot.lane.b32.xlu1 %v432_v1, %s1401_s11 }
  0x61   : > { %421 = vrot.lane.b32.xlu0 %v419_v2, %s1401_s11 }
  0x64   : > { %689 = vperm.xlu1 %1261, %v1550_v6  }
  0x65   : > { %444 = vrot.lane.b32.xlu0 %v442_v4, %s1402_s18 }
  0x68   : > { %457 = vrot.lane.b32.xlu1 %v455_v7, %s1402_s18 }
  0x69   : > { %611 = vperm.xlu0 %1260, %v1545_v5  }
  0x6c   : > { %693 = vperm.xlu1 %1261, %v1545_v5  }
  0x6d   : > { %1262 = vset.pattern.permute.xlu0 %v1403_v8 }
  0x6e   : > { %770 = vperm.xlu0 %1262, %v1550_v6  }
  0x70   : > { %1263 = vset.pattern.permute.xlu1 %v1403_v8 }
  0x71   : > { %774 = vperm.xlu1 %1263, %v1545_v5  }
  0x72   : > { %1265 = vset.pattern.permute.xlu0 %v1404_v11 }
  0x73   : > { %856 = vperm.xlu0 %1265, %v1545_v5  }
  0x75   : > { %1264 = vset.pattern.permute.xlu1 %v1404_v11 }
  0x76   : > { %852 = vperm.xlu1 %1264, %v1550_v6  }
  0x77   : > { %579 = vrot.lane.b32.xlu0 %v574_v12, %s1405_s29 }
  0x78   : > { %1267 = vset.pattern.permute.xlu0 %v1406_v16 }
  0x7a   : > { %1266 = vset.pattern.permute.xlu1 %v1407_v17 }
  0x7b   : > { %661 = vrot.lane.b32.xlu0 %v656_v14, %s1408_s4  ;;  %934 = vperm.xlu1 %1266, %v1550_v6  }
  0x7f   : > { %742 = vrot.lane.b32.xlu0 %v737_v18, %s1399_s9  ;;  %938 = vperm.xlu1 %1266, %v1545_v5  }
  0x83   : > { %824 = vrot.lane.b32.xlu0 %v819_v21, %s1409_s10  ;;  %581 = vrot.lane.b32.xlu1 %v578_v22, %s1405_s29  ;;  %s1415_s29 = smov 124  }
  0x84   : > { %1268 = vset.pattern.permute.xlu1 %v1406_v16 }
  0x87   : > { %906 = vrot.lane.b32.xlu0 %v901_v24, %s1410_s19  ;;  %663 = vrot.lane.b32.xlu1 %v660_v25, %s1408_s4 }
  0x8b   : > { %988 = vrot.lane.b32.xlu0 %v983_v27, %s1411_s21  ;;  %744 = vrot.lane.b32.xlu1 %v741_v28, %s1399_s9  ;;  %s1412_s9 = smov 127  }
  0x8f   : > { %478 = vperm.xlu0 %1267, %v1545_v5   ;;  %826 = vrot.lane.b32.xlu1 %v823_v29, %s1409_s10  ;;  %s1061_s10 = sshll.u32 %s202_s8, 4  ;;  %s1062_s10 = int_to_ptr.vmem [resolvable:$true] %s1061_s10 }
  0x93   : > { %1269 = vset.pattern.permute.xlu0 %v1407_v17  ;;  %908 = vrot.lane.b32.xlu1 %v905_v30, %s1410_s19  ;;  %s1059_s19 = scalar_lea.hbm %s1998_s3, %s1166_s7 }
  0x97   : > { %990 = vrot.lane.b32.xlu1 %v987_v31, %s1411_s21  ;;  %s1047_s21 = scalar_lea.sflag [#allocation7], %s1525_s22 }
  0x9b   : > { %473 = vperm.xlu1 %1268, %v1550_v6  }
  0xa7   : > { %v1620_v32 = vpop.permute.xlu1 %529  ;;  %v1624_v34 = vpop.permute.xlu0 %525 }
  0xac   : > { %v1622_v33 = vpop.permute.xlu1 %607 }
  0xbe   : > { %v327_v37 = vpop.permute.xlu1 %326 }
  0xbf   : > { %v304_v38 = vpop.permute.xlu0 %303  ;;  %v328_v39 = vrot.slane %v327_v37, 7 }
  0xc0   : > { %v305_v40 = vrot.slane %v304_v38, 7 }
  0xc1   : > { %v330_v41 = vsel %vm329_vm6, %v328_v39, %v327_v37 }
  0xc2   : > { %v307_v43 = vsel %vm306_vm8, %v305_v40, %v304_v38  ;;  %336 = vst.msk [vmem:[#allocation4 + $0x1] ss:$8 sm:$0x7] %vm334_vm7, %v330_v41  ;;  %v341_v44 = vpop.permute.xlu1 %340 }
  0xc3   : > { %312 = vst.msk [vmem:[#allocation4] ss:$8 sm:$0x7] %vm311_vm9, %v307_v43  ;;  %v317_v45 = vpop.permute.xlu0 %316  ;;  %v342_v46 = vrot.slane %v341_v44, 7 }
  0xc4   : > { %v318_v47 = vrot.slane %v317_v45, 7 }
  0xc5   : > { %v343_v50 = vsel %vm329_vm6, %v342_v46, %v341_v44  ;;  %vm427_vm6 = vcmp.lt.s32.totalorder %v207_v0, 227 }
  0xc6   : > { %v319_v51 = vsel %vm306_vm8, %v318_v47, %v317_v45  ;;  %346 = vst.msk [vmem:[#allocation4 + $0x18] ss:$8 sm:$0x7] %vm334_vm7, %v343_v50  ;;  %v365_v52 = vpop.permute.xlu1 %364  ;;  %vm447_vm7 = vcmask 678912   ;;  %vm1699_vm8 = vcmp.lt.s32.totalorder %v207_v0, 211 }
  0xc7   : > { %322 = vst.msk [vmem:[#allocation4 + $0x7] ss:$8 sm:$0x7] %vm311_vm9, %v319_v51  ;;  %v351_v53 = vpop.permute.xlu0 %350  ;;  %v366_v54 = vrot.slane %v365_v52, 7  ;;  %vm2000_vm9 = vcmask 7168  }
  0xc8   : > { %v352_v55 = vrot.slane %v351_v53, 7 }
  0xc9   : > { %v367_v57 = vsel %vm353_vm12, %v366_v54, %v365_v52 }
  0xca   : > { %v354_v58 = vsel %vm353_vm12, %v352_v55, %v351_v53  ;;  %370 = vst.msk [vmem:[#allocation4 + $0x19] ss:$8 sm:$0x7] %vm358_vm13, %v367_v57  ;;  %v389_v59 = vpop.permute.xlu1 %388  ;;  %vm702_vm12 = vcmask 1047576  }
  0xcb   : > { %360 = vst.msk [vmem:[#allocation4 + $0x2] ss:$8 sm:$0x7] %vm358_vm13, %v354_v58  ;;  %v375_v60 = vpop.permute.xlu0 %374  ;;  %v390_v61 = vrot.slane %v389_v59, 7  ;;  %vm485_vm13 = vcmask 1045504  }
  0xcc   : > { %v376_v62 = vrot.slane %v375_v60, 7 }
  0xcd   : > { %v391_v63 = vsel %vm1999_vm1, %v390_v61, %v389_v59 }
  0xce   : > { %v378_v1 = vsel %vm1999_vm1, %v376_v62, %v375_v60  ;;  %394 = vst.msk [vmem:[#allocation4 + $0x1a] ss:$8 sm:$0x7] %vm382_vm2, %v391_v63  ;;  %v412_v2 = vpop.permute.xlu1 %411 }
  0xcf   : > { %384 = vst.msk [vmem:[#allocation4 + $0x3] ss:$8 sm:$0x7] %vm382_vm2, %v378_v1  ;;  %v399_v4 = vpop.permute.xlu0 %398  ;;  %v413_v7 = vrot.slane %v412_v2, 1  ;;  %vm722_vm2 = vcmask 21504  }
  0xd0   : > { %v400_v8 = vrot.slane %v399_v4, 1 }
  0xd1   : > { %v414_v10 = vsel %vm401_vm3, %v412_v2, %v413_v7 }
  0xd2   : > { %v402_v11 = vsel %vm401_vm3, %v399_v4, %v400_v8  ;;  %417 = vst.msk [vmem:[#allocation4 + $0x1b] ss:$8 sm:$0x3] %vm404_vm4, %v414_v10  ;;  %v435_v12 = vpop.permute.xlu1 %434  ;;  %vm783_vm3 = vcmask 1047584  }
  0xd3   : > { %407 = vst.msk [vmem:[#allocation4 + $0x4] ss:$8 sm:$0x3] %vm404_vm4, %v402_v11  ;;  %v422_v13 = vpop.permute.xlu0 %421  ;;  %v436_v14 = vrot.slane %v435_v12, 1  ;;  %vm538_vm4 = vcmask 1047560  }
  0xd4   : > { %v423_v15 = vrot.slane %v422_v13, 1 }
  0xd5   : > { %v437_v16 = vsel %vm424_vm5, %v435_v12, %v436_v14  ;;  %v1696_v19 = vld [vmem:[#allocation4 + $0x28] sm:$0x3f] }
  0xd6   : > { %v425_v17 = vsel %vm424_vm5, %v422_v13, %v423_v15  ;;  %v1694_v18 = vld [vmem:[#allocation4 + $0x10] sm:$0xff]  ;;  %440 = vst.msk [vmem:[#allocation4 + $0x1c] ss:$8 sm:$0x3] %vm427_vm6, %v437_v16  ;;  %v537_v24 = vmul.f32 %v1620_v32, %v1696_v19  ;;  %vm622_vm5 = vcmask 1045520  }
  0xd7   : > { %430 = vst.msk [vmem:[#allocation4 + $0x5] ss:$8 sm:$0x3] %vm427_vm6, %v425_v17  ;;  %v445_v21 = vpop.permute.xlu0 %444  ;;  %v534_v25 = vmul.f32 %v1624_v34, %v1694_v18  ;;  %v616_v41 = vmul.f32 %v1622_v33, %v1694_v18  ;;  %vm704_vm6 = vcmask 1045528  }
  0xd8   : > { %v446_v23 = vrot.slane %v445_v21, 1  ;;  %v560_v27 = vsel %vm559_vm10, %v537_v24, 0.0  ;;  %vm802_vm10 = vcmask 31744  }
  0xd9   : > { %v558_v0 = vsel %vm2000_vm9, %v534_v25, 0.0  ;;  %v640_v54 = vsel %vm639_vm15, %v616_v41, 0.0  ;;  %vm886_vm9 = vcmask 37888  }
  0xda   : > { %v448_v26 = vsel %vm447_vm7, %v445_v21, %v446_v23  ;;  %v561_v28 = vadd.f32 %v560_v27, %v558_v0 }
  0xdb   : > { %453 = vst.msk [vmem:[#allocation4 + $0x6] ss:$8 sm:$0x3] %vm1699_vm8, %v448_v26 }
  0xdc   : > { %v562_v30 = vrot.slane %v561_v28, 4 }
  0xde   : > { %v563_v6 = vadd.f32 %v562_v30, %v561_v28 }
  0xdf   : > { %v690_v29 = vpop.permute.xlu1 %689 }
  0xe0   : > { %v564_v40 = vrot.slane %v563_v6, 2  ;;  %v698_v47 = vmul.f32 %v690_v29, %v1694_v18 }
  0xe2   : > { %v1719_v43 = vld [vmem:[#allocation4] sm:$0xff]  ;;  %v565_v50 = vadd.f32 %v564_v40, %v563_v6  ;;  %v1730_v51 = vld [vmem:[#allocation4 + $0x8] sm:$0xff]  ;;  %v721_v2 = vsel %vm1999_vm1, %v698_v47, 0.0  ;;  %vm867_vm1 = vcmask 1045544  }
  0xe3   : > { %v458_v31 = vpop.permute.xlu1 %457  ;;  %v614_v52 = vmul.f32 %v1622_v33, %v1719_v43  ;;  %v696_v58 = vmul.f32 %v690_v29, %v1719_v43  ;;  %v532_v62 = vmul.f32 %v1624_v34, %v1719_v43  ;;  %v697_v1 = vmul.f32 %v690_v29, %v1730_v51 }
  0xe4   : > { %v612_v35 = vpop.permute.xlu0 %611  ;;  %v459_v5 = vrot.slane %v458_v31, 1  ;;  %v566_v7 = vrot.slane %v565_v50, 1  ;;  %v615_v8 = vmul.f32 %v1622_v33, %v1730_v51  ;;  %v1756_v12 = vmul.f32 %v1624_v34, %v1730_v51 }
  0xe5   : > { %v619_v39 = vmul.f32 %v612_v35, %v1696_v19  ;;  %v621_v10 = vsel %vm620_vm14, %v614_v52, 0.0  ;;  %v703_v33 = vsel %vm702_vm12, %v696_v58, 0.0  ;;  %v539_v22 = vsel %vm538_vm4, %v532_v62, 0.0 }
  0xe6   : > { %v460_v36 = vsel %vm447_vm7, %v458_v31, %v459_v5  ;;  %vm785_vm7 = vcmask 1045536   ;;  %v1774_v27 = vadd.f32 %v566_v7, %v565_v50  ;;  %vm949_vm12 = vcmask 1045552  }
  0xe7   : > { %463 = vst.msk [vmem:[#allocation4 + $0x1d] ss:$8 sm:$0x3] %vm1699_vm8, %v460_v36  ;;  %v694_v37 = vpop.permute.xlu1 %693  ;;  %v642_v45 = vsel %vm641_vm11, %v619_v39, 0.0  ;;  %vm540_vm8 = vcmask 1045512   ;;  %vm804_vm11 = vcmask 29696  }
  0xe8   : > { %v701_v56 = vmul.f32 %v694_v37, %v1696_v19  ;;  %v643_v57 = vadd.f32 %v642_v45, %v640_v54  ;;  %vm947_vm14 = vcmask 1047600   ;;  %vm681_vm4 = vcmask 1031168  }
  0xe9   : > { %v1714_v38 = vpop.permute.xlu0 %770 }
  0xea   : > { %v777_v11 = vmul.f32 %v1714_v38, %v1719_v43  ;;  %v723_v15 = vsel %vm722_vm2, %v701_v56, 0.0  ;;  %v644_v16 = vrot.slane %v643_v57, 4  ;;  %v779_v21 = vmul.f32 %v1714_v38, %v1694_v18 }
  0xeb   : > { %v1776_v28 = vadd.f32 %v723_v15, %v721_v2  ;;  %v778_v29 = vmul.f32 %v1714_v38, %v1730_v51  ;;  %vm966_vm2 = vcmask 48128  }
  0xec   : > { %v1721_v44 = vpop.permute.xlu1 %774  ;;  %v784_v5 = vsel %vm783_vm3, %v777_v11, 0.0  ;;  %v1783_v36 = vadd.f32 %v644_v16, %v643_v57  ;;  %v1791_v41 = vsel %vm802_vm10, %v779_v21, 0.0  ;;  %vm2024_vm3 = vcmask 7168  }
  0xed   : > { %v725_v57 = vrot.slane %v1776_v28, 4 }
  0xee   : > { %v1723_v46 = vpop.permute.xlu0 %856  ;;  %v1726_v48 = vld [vmem:[#allocation4 + $0x18] sm:$0x3f]  ;;  %v1728_v49 = vld [vmem:[#allocation4 + $0x20] sm:$0x3f]  ;;  %v646_v2 = vrot.slane %v1783_v36, 2 }
  0xef   : > { %v617_v53 = vmul.f32 %v612_v35, %v1726_v48  ;;  %v699_v55 = vmul.f32 %v694_v37, %v1726_v48  ;;  %v618_v59 = vmul.f32 %v612_v35, %v1728_v49  ;;  %v700_v4 = vmul.f32 %v694_v37, %v1728_v49 }
  0xf0   : > { %v780_v24 = vmul.f32 %v1721_v44, %v1726_v48  ;;  %v781_v25 = vmul.f32 %v1721_v44, %v1728_v49  ;;  %v535_v30 = vmul.f32 %v1620_v32, %v1726_v48  ;;  %v782_v37 = vmul.f32 %v1721_v44, %v1696_v19 }
  0xf1   : > { %v623_v60 = vsel %vm622_vm5, %v617_v53, 0.0  ;;  %v1740_v61 = vpop.permute.xlu1 %852  ;;  %vm865_vm5 = vcmask 1047592   ;;  %v705_v14 = vsel %vm704_vm6, %v699_v55, 0.0  ;;  %v631_v17 = vsel %vm485_vm13, %v618_v59, 0.0 }
  0xf2   : > { %v1744_v63 = vpop.permute.xlu0 %579  ;;  %v624_v13 = vadd.f32 %v623_v60, %v621_v10  ;;  %v713_v34 = vsel %vm485_vm13, %v700_v4, 0.0  ;;  %v706_v0 = vadd.f32 %v705_v14, %v703_v33  ;;  %v632_v35 = vadd.f32 %v631_v17, %v615_v8 }
  0xf3   : > { %v714_v6 = vadd.f32 %v713_v34, %v697_v1  ;;  %v541_v39 = vsel %vm540_vm8, %v535_v30, 0.0  ;;  %v786_v38 = vsel %vm785_vm7, %v780_v24, 0.0  ;;  %v794_v45 = vsel %vm485_vm13, %v781_v25, 0.0 }
  0xf4   : > { %v625_v31 = vrot.slane %v624_v13, 4  ;;  %v859_v47 = vmul.f32 %v1740_v61, %v1719_v43  ;;  %v542_v50 = vadd.f32 %v541_v39, %v539_v22  ;;  %v707_v53 = vrot.slane %v706_v0, 4 }
  0xf5   : > { %v862_v44 = vmul.f32 %v1723_v46, %v1726_v48  ;;  %v863_v54 = vmul.f32 %v1723_v46, %v1728_v49  ;;  %v864_v55 = vmul.f32 %v1723_v46, %v1696_v19  ;;  %v633_v56 = vrot.slane %v632_v35, 4 }
  0xf6   : > { %v1765_v23 = vpop.permute.xlu0 %661  ;;  %v1772_v26 = vpop.permute.xlu1 %934  ;;  %v543_v58 = vrot.slane %v542_v50, 4  ;;  %v626_v59 = vadd.f32 %v625_v31, %v624_v13  ;;  %v715_v60 = vrot.slane %v714_v6, 4  ;;  %v787_v62 = vadd.f32 %v786_v38, %v784_v5 }
  0xf7   : > { %v795_v1 = vadd.f32 %v794_v45, %v778_v29  ;;  %v1808_v4 = vsel %vm804_vm11, %v782_v37, 0.0  ;;  %v860_v7 = vmul.f32 %v1740_v61, %v1730_v51  ;;  %v866_v8 = vsel %vm865_vm5, %v859_v47, 0.0 }
  0xf8   : > { %v544_v46 = vadd.f32 %v543_v58, %v542_v50  ;;  %v868_v11 = vsel %vm867_vm1, %v862_v44, 0.0  ;;  %v876_v13 = vsel %vm485_vm13, %v863_v54, 0.0  ;;  %v1818_v14 = vsel %vm886_vm9, %v864_v55, 0.0 }
  0xf9   : > { %v708_v15 = vadd.f32 %v707_v53, %v706_v0  ;;  %v634_v33 = vadd.f32 %v633_v56, %v632_v35  ;;  %v627_v21 = vrot.slane %v626_v59, 2  ;;  %v536_v22 = vmul.f32 %v1620_v32, %v1728_v49 }
  0xfa   : > { %v1788_v40 = vpop.permute.xlu0 %742  ;;  %v1797_v52 = vpop.permute.xlu1 %938  ;;  %v545_v17 = vrot.slane %v544_v46, 2  ;;  %v1824_v34 = vadd.f32 %v715_v60, %v714_v6  ;;  %v788_v24 = vrot.slane %v787_v62, 4  ;;  %v796_v25 = vrot.slane %v795_v1, 4 }
  0xfb   : > { %v869_v29 = vadd.f32 %v868_v11, %v866_v8  ;;  %vm968_vm1 = vcmask 46080   ;;  %v877_v30 = vadd.f32 %v876_v13, %v860_v7  ;;  %v944_v5 = vmul.f32 %v1797_v52, %v1726_v48 }
  0xfc   : > { %v546_v31 = vadd.f32 %v545_v17, %v544_v46  ;;  %v549_v0 = vsel %vm485_vm13, %v536_v22, 0.0  ;;  %v1833_v35 = vmul.f32 %v1740_v61, %v1694_v18  ;;  %v709_v32 = vrot.slane %v708_v15, 2 }
  0xfd   : > { %v945_v6 = vmul.f32 %v1797_v52, %v1728_v49  ;;  %v550_v39 = vadd.f32 %v549_v0, %v1756_v12  ;;  %v628_v45 = vadd.f32 %v627_v21, %v626_v59  ;;  %v941_v47 = vmul.f32 %v1772_v26, %v1719_v43 }
  0xfe   : > { %v1813_v10 = vpop.permute.xlu1 %581  ;;  %v1820_v16 = vpop.permute.xlu0 %824  ;;  %v547_v38 = vrot.slane %v546_v31, 1  ;;  %v635_v48 = vrot.slane %v634_v33, 2  ;;  %v1840_v50 = vadd.f32 %v796_v25, %v795_v1  ;;  %v870_v53 = vrot.slane %v869_v29, 4 }
  0xff   : > { %v942_v44 = vmul.f32 %v1772_v26, %v1730_v51  ;;  %v551_v61 = vrot.slane %v550_v39, 4  ;;  %v878_v55 = vrot.slane %v877_v30, 4  ;;  %v950_v49 = vsel %vm949_vm12, %v944_v5, 0.0 }
 0x100   : > { %v548_v56 = vadd.f32 %v547_v38, %v546_v31  ;;  %v636_v12 = vadd.f32 %v635_v48, %v634_v33  ;;  %vm884_vm9 = vcmask 39936   ;;  %v710_v59 = vadd.f32 %v709_v32, %v708_v15 }
 0x101   : > { %v958_v60 = vsel %vm485_vm13, %v945_v6, 0.0  ;;  %v789_v1 = vadd.f32 %v788_v24, %v787_v62  ;;  %v552_v7 = vadd.f32 %v551_v61, %v550_v39  ;;  %v629_v46 = vrot.slane %v628_v45, 1 }
 0x102   : > { %v1829_v37 = vpop.permute.xlu1 %663  ;;  %v1844_v54 = vpop.permute.xlu0 %906  ;;  %v587_v8 = vmul.f32 %v1744_v63, %v548_v56  ;;  %v1853_v11 = vmul.f32 %v1772_v26, %v1694_v18  ;;  %v946_v13 = vmul.f32 %v1797_v52, %v1696_v19  ;;  %v948_v33 = vsel %vm947_vm14, %v941_v47, 0.0 }
 0x103   : > { %v553_v17 = vrot.slane %v552_v7, 2  ;;  %v871_v21 = vadd.f32 %v870_v53, %v869_v29  ;;  %v726_v15 = vadd.f32 %v725_v57, %v1776_v28  ;;  %v1859_v22 = vadd.f32 %v878_v55, %v877_v30 }
 0x104   : > { %v951_v62 = vadd.f32 %v950_v49, %v948_v33  ;;  %v959_v24 = vadd.f32 %v958_v60, %v942_v44  ;;  %v637_v25 = vrot.slane %v636_v12, 1  ;;  %593 = vrot.lane.b32.xlu1 %v587_v8, %s1412_s9  ;;  %v711_v18 = vrot.slane %v710_v59, 1 }
 0x105   : > { %v790_v26 = vrot.slane %v789_v1, 2  ;;  %v554_v5 = vadd.f32 %v553_v17, %v552_v7  ;;  %v727_v52 = vrot.slane %v726_v15, 2  ;;  %v630_v29 = vadd.f32 %v629_v46, %v628_v45  ;;  %v468_v17 = vld [vmem:[#allocation4 + $0x20] sm:$0x3f] }
 0x106   : > { %v1847_v58 = vpop.permute.xlu1 %744  ;;  %v1864_v19 = vpop.permute.xlu0 %988  ;;  %v969_v28 = vsel %vm968_vm1, %v946_v13, 0.0  ;;  %v589_v57 = vmul.f32 %v1813_v10, %v1774_v27  ;;  %v647_v30 = vadd.f32 %v646_v2, %v1783_v36  ;;  %v872_v32 = vrot.slane %v871_v21, 2 }
 0x107   : > { %v555_v0 = vrot.slane %v554_v5, 1  ;;  %v665_v6 = vsel %vm639_vm15, %v1765_v23, %v1829_v37  ;;  %v717_v39 = vrot.slane %v1824_v34, 2  ;;  %v583_v38 = vsel %vm2024_vm3, %v1744_v63, %v1813_v10 }
 0x108   : > { %v638_v45 = vadd.f32 %v637_v25, %v636_v12  ;;  %v728_v47 = vadd.f32 %v727_v52, %v726_v15  ;;  %597 = vrot.lane.b32.xlu1 %v589_v57, %s1412_s9  ;;  %v798_v27 = vrot.slane %v1840_v50, 2  ;;  %v712_v36 = vadd.f32 %v711_v18, %v710_v59 }
 0x109   : > { %v960_v2 = vrot.slane %v959_v24, 4  ;;  %v1883_v53 = vadd.f32 %v790_v26, %v789_v1  ;;  %v556_v44 = vadd.f32 %v555_v0, %v554_v5  ;;  %v952_v61 = vrot.slane %v951_v62, 4 }
 0x10a   : > { %v1862_v31 = vpop.permute.xlu1 %826  ;;  %v648_v55 = vrot.slane %v647_v30, 1  ;;  %v670_v56 = vmul.f32 %v665_v6, %v638_v45  ;;  %v806_v49 = vadd.f32 %v1808_v4, %v1791_v41  ;;  %v873_v10 = vadd.f32 %v872_v32, %v871_v21  ;;  %v479_v60 = vpop.permute.xlu0 %478 }
 0x10b   : > { %v588_v63 = vmul.f32 %v583_v38, %v556_v44  ;;  %v718_v12 = vadd.f32 %v717_v39, %v1824_v34  ;;  %v885_v7 = vsel %vm884_vm9, %v1833_v35, 0.0  ;;  %v729_v8 = vrot.slane %v728_v47, 1  ;;  %v467_v35 = vld [vmem:[#allocation4 + $0x18] sm:$0x3f] }
 0x10c   : > { %v799_v59 = vadd.f32 %v798_v27, %v1840_v50  ;;  %v807_v1 = vrot.slane %v806_v49, 4  ;;  %677 = vrot.lane.b32.xlu1 %v670_v56, %s1413_s23  ;;  %v888_v46 = vadd.f32 %v1818_v14, %v885_v7  ;;  %v669_v41 = vmul.f32 %v1765_v23, %v630_v29 }
 0x10d   : > { %v750_v4 = vmul.f32 %v1788_v40, %v712_v36  ;;  %v961_v34 = vadd.f32 %v960_v2, %v959_v24  ;;  %v792_v33 = vrot.slane %v1883_v53, 1  ;;  %595 = vrot.lane.b32.xlu0 %v588_v63, %s1412_s9  ;;  %v483_v50 = vmul.f32 %v479_v60, %v467_v35  ;;  %s1307_s9 = scalar_lea.vmem %s1062_s10, 32 }
 0x10e   : > { %v1881_v48 = vpop.permute.xlu1 %908  ;;  %v484_v21 = vmul.f32 %v479_v60, %v468_v17  ;;  %v808_v15 = vadd.f32 %v807_v1, %v806_v49  ;;  %v889_v25 = vrot.slane %v888_v46, 4  ;;  %v874_v18 = vrot.slane %v873_v10, 1  ;;  %p1308_p8 = scmp.ne.s32.totalorder %s1062_s10, %s1307_s9 }
 0x10f   : > { %v649_v26 = vadd.f32 %v648_v55, %v647_v30  ;;  %v953_v14 = vadd.f32 %v952_v61, %v951_v62  ;;  %v719_v5 = vrot.slane %v718_v12, 1  ;;  %v730_v52 = vadd.f32 %v729_v8, %v728_v47 }
 0x110   : > { %v800_v57 = vrot.slane %v799_v59, 1  ;;  %v890_v23 = vadd.f32 %v889_v25, %v888_v46  ;;  %756 = vrot.lane.b32.xlu1 %v750_v4, %s1414_s28  ;;  %v967_v24 = vsel %vm966_vm2, %v1853_v11, 0.0  ;;  %v809_v0 = vrot.slane %v808_v15, 2  ;;  %p1309_p11 = pnand %p1308_p8, %p1490_p9 }
 0x111   : > { %675 = vrot.lane.b32.xlu0 %v669_v41, %s1413_s23  ;;  %v970_v32 = vadd.f32 %v969_v28, %v967_v24  ;;  %v752_v62 = vmul.f32 %v1847_v58, %v730_v52  ;;  %v486_v39 = vsel %vm485_vm13, %v483_v50, 0.0  ;;  %v494_v38 = vsel %vm485_vm13, %v484_v21, 0.0 }
 0x112   : > { %v1893_v13 = vpop.permute.xlu1 %990  ;;  %v891_v45 = vrot.slane %v890_v23, 2  ;;  %v671_v47 = vmul.f32 %v1829_v37, %v649_v26  ;;  %v828_v11 = vsel %vm802_vm10, %v1820_v16, %v1862_v31  ;;  %vm2025_vm15 = vcmask 23552   ;;  %p1310_p12 = pneg %p1309_p11 }
 0x113   : > { %v962_v2 = vrot.slane %v961_v34, 2  ;;  %v720_v44 = vadd.f32 %v719_v5, %v718_v12  ;;  %v810_v61 = vadd.f32 %v809_v0, %v808_v15  ;;  %v880_v37 = vrot.slane %v1859_v22, 2 }
 0x114   : > { %v892_v28 = vadd.f32 %v891_v45, %v890_v23  ;;  %760 = vrot.lane.b32.xlu1 %v752_v62, %s1414_s28  ;;  %v971_v55 = vrot.slane %v970_v32, 4  ;;  %v875_v56 = vadd.f32 %v874_v18, %v873_v10  ;;  %v793_v63 = vadd.f32 %v792_v33, %v1883_v53 }
 0x115   : > { %679 = vrot.lane.b32.xlu0 %v671_v47, %s1413_s23  ;;  %v954_v60 = vrot.slane %v953_v14, 2  ;;  %v992_v50 = vsel %vm966_vm2, %v1864_v19, %v1893_v13  ;;  %vm599_vm13 = vcmask 1039360   ;;  %vm762_vm6 = vcmask 1022976   ;;  %s1311_s23 = sshll.u32 %s1418_s15, 4  ;;  %s1312_s23 = int_to_ptr.vmem [resolvable:$false] %s1311_s23 }
 0x116   : > { %v474_v29 = vpop.permute.xlu1 %473  ;;  %v893_v8 = vrot.slane %v892_v28, 1  ;;  %v972_v12 = vadd.f32 %v971_v55, %v970_v32  ;;  %v914_v1 = vmul.f32 %v1844_v54, %v875_v56  ;;  %v832_v46 = vmul.f32 %v1820_v16, %v793_v63  ;;  %p1314_p0 = scmp.lt.s32.totalorder %s1062_s10, %s1312_s23 }
 0x117   : > { %v481_v6 = vmul.f32 %v1719_v43, %v474_v29  ;;  %v482_v30 = vmul.f32 %v1730_v51, %v474_v29  ;;  %v746_v43 = vsel %vm2025_vm15, %v1788_v40, %v1847_v58  ;;  %v801_v51 = vadd.f32 %v800_v57, %v799_v59 }
 0x118   : > { %v751_v7 = vmul.f32 %v746_v43, %v720_v44  ;;  %v963_v40 = vadd.f32 %v962_v2, %v961_v34  ;;  %v811_v58 = vrot.slane %v810_v61, 1  ;;  %v881_v59 = vadd.f32 %v880_v37, %v1859_v22  ;;  %v502_v43 = vld [vmem:[%s1996_s1] ss:$8 sm:$0x3] }
 0x119   : > { %v487_v27 = vadd.f32 %v486_v39, %v481_v6  ;;  %v1912_v36 = vadd.f32 %v494_v38, %v482_v30  ;;  %v833_v49 = vmul.f32 %v828_v11, %v801_v51  ;;  %v955_v10 = vadd.f32 %v954_v60, %v953_v14 }
 0x11a   : > { %758 = vrot.lane.b32.xlu0 %v751_v7, %s1414_s28  ;;  %v894_v41 = vadd.f32 %v893_v8, %v892_v28  ;;  %v964_v4 = vrot.slane %v963_v40, 1  ;;  %v812_v53 = vadd.f32 %v811_v58, %v810_v61  ;;  %v882_v33 = vrot.slane %v881_v59, 1  ;;  %s1313_s28 = scalar_lea.vmem %s1312_s23, 64 }
 0x11b   : > { %840 = vrot.lane.b32.xlu1 %v833_v49, %s1415_s29  ;;  %v973_v34 = vrot.slane %v972_v12, 2  ;;  %v956_v17 = vrot.slane %v955_v10, 1  ;;  %v910_v16 = vsel %vm884_vm9, %v1844_v54, %v1881_v48  ;;  %v496_v29 = vrot.slane %v1912_v36, 4  ;;  %p1315_p1 = scmp.lt.s32.totalorder %s1313_s28, %s1307_s9 }
 0x11c   : > { %v916_v35 = vmul.f32 %v1881_v48, %v894_v41  ;;  %v834_v22 = vmul.f32 %v1862_v31, %v812_v53  ;;  %v965_v21 = vadd.f32 %v964_v4, %v963_v40  ;;  %v883_v15 = vadd.f32 %v882_v33, %v881_v59 }
 0x11d   : > { %v974_v25 = vadd.f32 %v973_v34, %v972_v12  ;;  %v957_v26 = vadd.f32 %v956_v17, %v955_v10  ;;  %v488_v48 = vrot.slane %v487_v27, 4  ;;  %v497_v30 = vadd.f32 %v496_v29, %v1912_v36  ;;  %p1316_p2 = por %p1315_p1, %p1314_p0 }
 0x11e   : > { %838 = vrot.lane.b32.xlu0 %v832_v46, %s1415_s29  ;;  %v997_v18 = vmul.f32 %v992_v50, %v965_v21  ;;  %v915_v14 = vmul.f32 %v910_v16, %v883_v15  ;;  %v507_v2 = vrot.slane %v502_v43, %v1576_v9  ;;  %v511_v56 = vrot.slane %v502_v43, %v1598_v20 }
 0x11f   : > { %920 = vrot.lane.b32.xlu1 %v914_v1, %s1416_s24  ;;  %v975_v5 = vrot.slane %v974_v25, 1  ;;  %v996_v31 = vmul.f32 %v1864_v19, %v957_v26  ;;  %v489_v24 = vadd.f32 %v488_v48, %v487_v27  ;;  %v498_v19 = vrot.slane %v497_v30, 2  ;;  %p1317_p3 = pnand %p1316_p2, %p1310_p12 }
 0x120   : > { %vm844_vm7 = vcmask 1014784   ;;  %vm926_vm8 = vcmask 1006592   ;;  %vm1008_vm10 = vcmask 998400  }
 0x121   : > { %v976_v52 = vadd.f32 %v975_v5, %v974_v25  ;;  %v490_v6 = vrot.slane %v489_v24, 2  ;;  %v499_v11 = vadd.f32 %v498_v19, %v497_v30 }
 0x122   : > { %842 = vrot.lane.b32.xlu0 %v834_v22, %s1415_s29 }
 0x123   : > { %924 = vrot.lane.b32.xlu1 %v916_v35, %s1416_s24  ;;  %v998_v57 = vmul.f32 %v1893_v13, %v976_v52  ;;  %v491_v38 = vadd.f32 %v490_v6, %v489_v24  ;;  %v500_v44 = vrot.slane %v499_v11, 1 }
 0x125   : > { %v492_v13 = vrot.slane %v491_v38, 1  ;;  %v501_v49 = vadd.f32 %v500_v44, %v499_v11 }
 0x126   : > { %922 = vrot.lane.b32.xlu0 %v915_v14, %s1416_s24 }
 0x127   : > { %1004 = vrot.lane.b32.xlu1 %v997_v18, %s1417_s30  ;;  %v493_v28 = vadd.f32 %v492_v13, %v491_v38  ;;  %v515_v58 = vmul.f32 %v511_v56, %v501_v49 }
 0x129   : > { %v514_v55 = vmul.f32 %v507_v2, %v493_v28 }
 0x12a   : > { %1002 = vrot.lane.b32.xlu0 %v996_v31, %s1417_s30 }
 0x12e   : > { %1006 = vrot.lane.b32.xlu0 %v998_v57, %s1417_s30 }
 0x176   : > { %v594_v54 = vpop.permute.xlu1 %593 }
 0x17a   : > { %v598_v23 = vpop.permute.xlu1 %597 }
 0x17e   : > { %v678_v0 = vpop.permute.xlu1 %677 }
 0x17f   : > { %v596_v32 = vpop.permute.xlu0 %595 }
 0x180   : > { %v600_v37 = vsel %vm599_vm13, %v594_v54, %v596_v32  ;;  %v601_v40 = vsel %vm599_vm13, %v596_v32, %v598_v23 }
 0x181   : > { %v604_v60 = vadd.f32 %v600_v37, %v514_v55  ;;  %v605_v46 = vadd.f32 %v601_v40, %v515_v58 }
 0x182   : > { %v757_v62 = vpop.permute.xlu1 %756 }
 0x183   : > { %v676_v39 = vpop.permute.xlu0 %675 }
 0x184   : > { %v682_v63 = vsel %vm681_vm4, %v676_v39, %v678_v0 }
 0x185   : > { %v686_v59 = vadd.f32 %v682_v63, %v604_v60 }
 0x186   : > { %v761_v45 = vpop.permute.xlu1 %760 }
 0x187   : > { %v680_v47 = vpop.permute.xlu0 %679 }
 0x188   : > { %v683_v12 = vsel %vm681_vm4, %v678_v0, %v680_v47 }
 0x189   : > { %v687_v53 = vadd.f32 %v683_v12, %v605_v46 }
 0x18c   : > { %v759_v51 = vpop.permute.xlu0 %758 }
 0x18d   : > { %v841_v27 = vpop.permute.xlu1 %840  ;;  %v763_v9 = vsel %vm762_vm6, %v757_v62, %v759_v51  ;;  %v764_v41 = vsel %vm762_vm6, %v759_v51, %v761_v45 }
 0x18e   : > { %v767_v20 = vadd.f32 %v763_v9, %v686_v59  ;;  %v768_v17 = vadd.f32 %v764_v41, %v687_v53 }
 0x190   : > { %v839_v61 = vpop.permute.xlu0 %838 }
 0x191   : > { %v921_v36 = vpop.permute.xlu1 %920  ;;  %v845_v1 = vsel %vm844_vm7, %v839_v61, %v841_v27 }
 0x192   : > { %v849_v33 = vadd.f32 %v845_v1, %v767_v20 }
 0x194   : > { %v843_v7 = vpop.permute.xlu0 %842 }
 0x195   : > { %v925_v8 = vpop.permute.xlu1 %924  ;;  %v846_v35 = vsel %vm844_vm7, %v841_v27, %v843_v7 }
 0x196   : > { %v850_v15 = vadd.f32 %v846_v35, %v768_v17 }
 0x198   : > { %v923_v10 = vpop.permute.xlu0 %922 }
 0x199   : > { %v927_v4 = vsel %vm926_vm8, %v921_v36, %v923_v10  ;;  %v1005_v34 = vpop.permute.xlu1 %1004  ;;  %v928_v16 = vsel %vm926_vm8, %v923_v10, %v925_v8 }
 0x19a   : > { %v931_v22 = vadd.f32 %v927_v4, %v849_v33  ;;  %v932_v18 = vadd.f32 %v928_v16, %v850_v15 }
 0x19c   : > { %v1003_v50 = vpop.permute.xlu0 %1002 }
 0x19d   : > { %v1009_v21 = vsel %vm1008_vm10, %v1003_v50, %v1005_v34 }
 0x19e   : > { %v1013_v25 = vadd.f32 %v1009_v21, %v931_v22 }
 0x1a0   : > { %v1158_v26 = vmul.f32 -1.442695, %v1013_v25  ;;  %v1007_v14 = vpop.permute.xlu0 %1006 }
 0x1a1   : > { %v1010_v5 = vsel %vm1008_vm10, %v1005_v34, %v1007_v14 }
 0x1a2   : > { %1271 = vpow2.f32 %v1158_v26  ;;  %v1014_v31 = vadd.f32 %v1010_v5, %v932_v18 }
 0x1a4   : > { %v1159_v52 = vmul.f32 -1.442695, %v1014_v31 }
 0x1a6   : > { %1273 = vpow2.f32 %v1159_v52 }
 0x1af   : > { %v1272_v57 = vpop.eup %1271 }
 0x1b0   : > { %v1021_v54 = vadd.f32 1.0, %v1272_v57 }
 0x1b2   : > { %1275 = vrcp.f32 %v1021_v54 }
 0x1b3   : > { %v1274_v48 = vpop.eup %1273 }
 0x1b4   : > { %v1022_v23 = vadd.f32 1.0, %v1274_v48 }
 0x1b6   : > { %1277 = vrcp.f32 %v1022_v23 }
 0x1bf   : > { %v1276_v24 = vpop.eup %1275 }
 0x1c3   : > { %v1278_v29 = vpop.eup %1277 }
 0x1c4   : > { %v1029_v0 = vcombine.low %v1276_v24, %v1278_v29 }
 0x1c6   : > { %v1036_v32 = vrot.slane %v1029_v0, %v1559_v42 }
 0x1c8   : > { %v1043_v6 = vrot.slane %v1036_v32, %v1559_v42 }
 0x1ca   : > { %1045 = vst.msk [vmem:[%s202_s8] sm:$0x3] %vm1534_vm0, %v1043_v6 }
 0x1cb   : > { %1320 = shalt.err (!%p1317_p3)
}
 0x1cc   : > { %s1321_s29 = scalar_lea.hbm %s1059_s19, 32  ;;  %s1325_s30 = scalar_lea.hbm %s1998_s3, 64 }
 0x1cd   : > { %p1322_p5 = scmp.ne.s32.totalorder %s1059_s19, %s1321_s29  ;;  %p1326_p10 = scmp.lt.s32.totalorder %s1059_s19, %s1998_s3 }
 0x1ce   : > { %p1327_p4 = scmp.lt.s32.totalorder %s1325_s30, %s1321_s29 }
 0x1cf   : > { %p1323_p6 = pnand %p1322_p5, %p1490_p9 }
 0x1d0   : > { %p1328_p13 = por %p1327_p4, %p1326_p10 }
 0x1d1   : > { %p1324_p7 = pneg %p1323_p6 }
 0x1d3   : > { %p1329_p8 = pnand %p1328_p13, %p1324_p7 }
 0x1d5   : > { %1332 = shalt.err (!%p1329_p8)
}
 0x1d6   : > { %1169 = dma.vmem_to_hbm [thread:$0]  (%p1490_p9), %s1062_s10, 32, %s1059_s19, %s1047_s21  }
 0x1d7 PF: > { %s1073_s6 = sand.u32 1, %s1367_s12   ;;  %p2026_p11 = scmp.ne.s32.totalorder %s2004_s27, 0 }
 0x1d8   : > { %p2027_p12 = scmp.ge.s32.totalorder %s1387_s17, 2  ;;  %s1074_s7 = scalar_lea.sflag [#allocation7], %s1073_s6 }
 0x1da   : > { %p1176_p0 = pnand %p2027_p12, %p2026_p11 }
 0x1dc   : > { %p1177_p1 = pneg %p1176_p0 }
 0x1de   : > { %1362 = dma.done.wait (%p1177_p1), %s1074_s7, 32  }
 0x1df   : > { %1364 = vsyncadd (%p1177_p1), %s1074_s7, 4294967264  ;;  %s19_s17 = sadd.s32 1, %s1387_s17   ;;  %s2028_s12 = smov %s1371_s13 }
 0x1e0   : > { %p16_p2 = scmp.ge.s32.totalorder %s19_s17, 4   ;;  %s2029_s13 = smov %s1375_s14 }
 0x1e1   : > { %s2030_s14 = smov %s1495_s26  ;;  %s2031_s15 = smov %s1383_s16 }
 0x1e2   : > { %s2032_s16 = smov %s2034_s20  ;;  %18 = sbr.rel (!%p16_p2) target bundleno = 6 (0x6), region = 104 }
 0x1e7   :  { %1079 = vsyncpa [#allocation6], 1 }
 0x1e8   :  { %1081 = vsyncpa [#allocation6 + $0x1], 1 }
 0x1e9   :  { %1082 = vsyncpa [#allocation7], 1 }
 0x1ea   :  { %1084 = vsyncpa [#allocation7 + $0x1], 1 }

</bundles_post_ra>
